<compile_context>
chip_gen: v6e
topology: v6e:2x2x1
jax: 0.10.0
libtpu: 0.0.40
codegen_flags: <defaults>
</compile_context>

<pallas_src>
import jax
import jax.numpy as jnp
from jax.experimental import pallas as pl
from jax.experimental.pallas import tpu as pltpu


def dense_kernel(x_ref, w_ref, b_ref, o_ref, acc_ref):
    # x_ref: (tm, tk), w_ref: (tk, tn), b_ref: (1, tn),
    # o_ref: (tm, tn), acc_ref: (tm, tn) f32 scratch.
    k = pl.program_id(2)

    @pl.when(k == 0)
    def _():
        # Seed the f32 accumulator with the broadcast bias: no epilogue add.
        acc_ref[...] = jnp.broadcast_to(
            b_ref[...].astype(jnp.float32), acc_ref.shape
        )

    acc_ref[...] += jnp.dot(
        x_ref[...], w_ref[...], preferred_element_type=jnp.float32
    )

    @pl.when(k == pl.num_programs(2) - 1)
    def _():
        o_ref[...] = acc_ref[...].astype(o_ref.dtype)


def _round_up(v, m):
    return -(-v // m) * m


def _pick_tile(dim, pref, align, min_frac=2):
    """Pick a tile for `dim`: the largest multiple of `align` that is <= `pref`
    and divides round_up(dim, align) (so no padding of the operand is needed).
    Falls back to `pref` (aligned) if no divisor >= pref // min_frac exists."""
    pref = max(align, (pref // align) * align)
    dim_r = _round_up(dim, align)
    if dim_r <= pref:
        return dim_r
    t = pref
    lo = max(align, pref // min_frac)
    while t >= lo:
        if dim_r % t == 0:
            return t
        t -= align
    return pref


def dense(x, w, b, *, tm=512, tn=1024, tk=512, use_bf16_operands=False):
    """out = x @ w + b   (x: (M, K), w: (K, N), b: (N,))."""
    M, K = x.shape
    Kw, N = w.shape
    assert K == Kw and b.shape == (N,)

    out_dtype = x.dtype
    op_dtype = jnp.bfloat16 if use_bf16_operands else x.dtype
    if x.dtype != op_dtype:
        x = x.astype(op_dtype)
    if w.dtype != op_dtype:
        w = w.astype(op_dtype)
    # Bias stays f32: it seeds the f32 accumulator inside the kernel.
    b2d = b.reshape(1, N).astype(jnp.float32)

    M_r = _round_up(M, 8)
    N_r = _round_up(N, 128)
    K_r = _round_up(K, 128)

    # --- tile selection ------------------------------------------------------
    tm = _pick_tile(M, tm, 8)

    # Megacore (v7x has 2 TensorCores): for single-i-tile (skinny-M) problems,
    # make sure the j axis has at least two tiles so both cores get work.
    if M_r <= tm and N_r >= 256:
        tn = min(tn, max(128, ((N_r // 2) // 128) * 128))
    tn = _pick_tile(N, tn, 128)
    tk = _pick_tile(K, tk, 128)

    # --- VMEM budget ---------------------------------------------------------
    op_itemsize = jnp.dtype(op_dtype).itemsize
    out_itemsize = jnp.dtype(out_dtype).itemsize

    def _vmem_need(tm_, tn_, tk_):
        return (2 * (tm_ * tk_ + tk_ * tn_) * op_itemsize  # dbl-buffered x, w
                + 2 * tn_ * 4                              # dbl-buffered bias
                + tm_ * tn_ * 4                            # f32 accumulator
                + 2 * tm_ * tn_ * out_itemsize)            # dbl-buffered out

    try:
        phys_vmem = int(pltpu.get_tpu_info().vmem_capacity_bytes)
    except Exception:
        phys_vmem = 64 << 20  # v7x-safe assumption
    vmem_cap = (phys_vmem * 3) // 4
    headroom = 4 << 20

    # Shrink tiles if a user-supplied config would overshoot physical VMEM.
    while _vmem_need(tm, tn, tk) + headroom > vmem_cap and tn > 256:
        tn = _pick_tile(N, tn // 2, 128)
    while _vmem_need(tm, tn, tk) + headroom > vmem_cap and tm > 256:
        tm = _pick_tile(M, tm // 2, 8)

    vmem_limit_bytes = int(
        min(vmem_cap, max(32 << 20, _vmem_need(tm, tn, tk) + headroom))
    )

    # --- padding (only when strictly required) -------------------------------
    Mp, Np, Kp = _round_up(M, tm), _round_up(N, tn), _round_up(K, tk)
    if (Mp, Kp) != (M, K):
        x = jnp.pad(x, ((0, Mp - M), (0, Kp - K)))
    if (Kp, Np) != (K, N):
        w = jnp.pad(w, ((0, Kp - K), (0, Np - N)))
    if Np != N:
        b2d = jnp.pad(b2d, ((0, 0), (0, Np - N)))

    cost = pl.CostEstimate(
        flops=2 * M * N * K,
        transcendentals=0,
        bytes_accessed=(Mp * Kp * op_itemsize + Kp * Np * op_itemsize
                        + Np * 4 + Mp * Np * out_itemsize),
    )

    out_p = pl.pallas_call(
        dense_kernel,
        out_shape=jax.ShapeDtypeStruct((Mp, Np), out_dtype),
        grid_spec=pltpu.PrefetchScalarGridSpec(
            num_scalar_prefetch=0,
            grid=(Mp // tm, Np // tn, Kp // tk),
            in_specs=[
                pl.BlockSpec((tm, tk), lambda i, j, k: (i, k)),
                pl.BlockSpec((tk, tn), lambda i, j, k: (k, j)),
                pl.BlockSpec((1, tn), lambda i, j, k: (0, j)),
            ],
            out_specs=pl.BlockSpec((tm, tn), lambda i, j, k: (i, j)),
            scratch_shapes=[pltpu.VMEM((tm, tn), jnp.float32)],
        ),
        compiler_params=pltpu.CompilerParams(
            dimension_semantics=("parallel", "parallel", "arbitrary"),
            vmem_limit_bytes=vmem_limit_bytes,
        ),
        cost_estimate=cost,
    )(x, w, b2d)

    if (Mp, Np) != (M, N):
        out_p = out_p[:M, :N]
    return out_p


if __name__ == "__main__":
    key = jax.random.PRNGKey(0)
    k_x, k_w, k_b, k_x2, k_w2, k_b2 = jax.random.split(key, 6)

    def ref_dense(x, w, b):
        return jnp.dot(x, w, precision=jax.lax.Precision.HIGHEST) + b

    # Case 1: aligned shapes (no padding path), f32 operands.
    M, K, N = 256, 512, 512
    x = jax.random.normal(k_x, (M, K), dtype=jnp.float32)
    w = jax.random.normal(k_w, (K, N), dtype=jnp.float32) * 0.05
    b = jax.random.normal(k_b, (N,), dtype=jnp.float32)

    out = jax.block_until_ready(dense(x, w, b))
    ref = ref_dense(x, w, b)
    assert out.shape == (M, N)
    assert jnp.allclose(out, ref, atol=2e-3, rtol=2e-3), "mismatch (aligned f32)"

    # Case 2: shapes that do NOT divide the tiles (padding + skinny-M path).
    M2, K2, N2 = 10, 37, 130
    x2 = jax.random.normal(k_x2, (M2, K2), dtype=jnp.float32)
    w2 = jax.random.normal(k_w2, (K2, N2), dtype=jnp.float32) * 0.05
    b2 = jax.random.normal(k_b2, (N2,), dtype=jnp.float32)

    out2 = jax.block_until_ready(dense(x2, w2, b2))
    ref2 = ref_dense(x2, w2, b2)
    assert out2.shape == (M2, N2)
    assert jnp.allclose(out2, ref2, atol=2e-3, rtol=2e-3), "mismatch (padded f32)"

    # Case 3: opt-in bf16 operand path (f32 accumulation), looser tolerance.
    out3 = jax.block_until_ready(dense(x, w, b, use_bf16_operands=True))
    assert out3.shape == (M, N)
    assert jnp.allclose(out3, ref, atol=7e-2, rtol=7e-2), "mismatch (bf16 operands)"

    print("KERNEL_OK")
</pallas_src>

<mosaic_0001>
module attributes {stable_mosaic.version = 11 : i64} {
  func.func @dense_kernel(%arg0: i32, %arg1: i32, %arg2: i32, %arg3: memref<256x512xf32, #tpu.memory_space<vmem>>, %arg4: memref<512x256xf32, #tpu.memory_space<vmem>>, %arg5: memref<1x256xf32, #tpu.memory_space<vmem>>, %arg6: memref<256x256xf32, #tpu.memory_space<vmem>>, %arg7: memref<256x256xf32, #tpu.memory_space<vmem>>) attributes {dimension_semantics = [#tpu.dimension_semantics<parallel>, #tpu.dimension_semantics<parallel>, #tpu.dimension_semantics<arbitrary>], iteration_bounds = array<i64: 1, 2, 1>, scalar_prefetch = 0 : i64, scratch_operands = 1 : i64, tpu.core_type = #tpu.core_type<tc>, window_params = [{transform_indices = @transform_0, window_bounds = array<i64: 256, 512>}, {transform_indices = @transform_1, window_bounds = array<i64: 512, 256>}, {transform_indices = @transform_2, window_bounds = array<i64: 1, 256>}, {transform_indices = @transform_3, window_bounds = array<i64: 256, 256>}]} {
    %c0_i32 = arith.constant 0 : i32
    %0 = arith.cmpi eq, %arg2, %c0_i32 : i32
    %1 = arith.extui %0 : i1 to i32
    %c0_i32_0 = arith.constant 0 : i32
    %2 = arith.cmpi ne, %1, %c0_i32_0 : i32
    scf.if %2 {
      %c0_10 = arith.constant 0 : index
      %c0_11 = arith.constant 0 : index
      %12 = vector.load %arg5[%c0_10, %c0_11] : memref<1x256xf32, #tpu.memory_space<vmem>>, vector<1x256xf32>
      %13 = vector.shape_cast %12 : vector<1x256xf32> to vector<1x256xf32>
      %14 = vector.broadcast %13 : vector<1x256xf32> to vector<256x256xf32>
      %c0_12 = arith.constant 0 : index
      %c0_13 = arith.constant 0 : index
      %15 = vector.load %arg7[%c0_12, %c0_13] : memref<256x256xf32, #tpu.memory_space<vmem>>, vector<256x256xf32>
      tpu.vector_store %arg7[%c0_12, %c0_13], %14 {strides = array<i32>} : memref<256x256xf32, #tpu.memory_space<vmem>>, vector<256x256xf32>,
    } else {
    }
    %c0 = arith.constant 0 : index
    %c0_1 = arith.constant 0 : index
    %3 = vector.load %arg7[%c0, %c0_1] : memref<256x256xf32, #tpu.memory_space<vmem>>, vector<256x256xf32>
    %c0_2 = arith.constant 0 : index
    %c0_3 = arith.constant 0 : index
    %4 = vector.load %arg3[%c0_2, %c0_3] : memref<256x512xf32, #tpu.memory_space<vmem>>, vector<256x512xf32>
    %c0_4 = arith.constant 0 : index
    %c0_5 = arith.constant 0 : index
    %5 = vector.load %arg4[%c0_4, %c0_5] : memref<512x256xf32, #tpu.memory_space<vmem>>, vector<512x256xf32>
    %cst = arith.constant dense<0.000000e+00> : vector<256x256xf32>
    %6 = tpu.matmul %4, %5, %cst {dimension_numbers = #tpu.dot_dimension_numbers<[1], [0], [0], [1], [0, 0, 1, 1], [], []>} : vector<256x512xf32>, vector<512x256xf32>, vector<256x256xf32> -> vector<256x256xf32>
    %7 = arith.addf %3, %6 : vector<256x256xf32>
    %c0_6 = arith.constant 0 : index
    %c0_7 = arith.constant 0 : index
    %8 = vector.load %arg7[%c0_6, %c0_7] : memref<256x256xf32, #tpu.memory_space<vmem>>, vector<256x256xf32>
    tpu.vector_store %arg7[%c0_6, %c0_7], %7 {strides = array<i32>} : memref<256x256xf32, #tpu.memory_space<vmem>>, vector<256x256xf32>,
    %c0_i32_8 = arith.constant 0 : i32
    %9 = arith.cmpi eq, %arg2, %c0_i32_8 : i32
    %10 = arith.extui %9 : i1 to i32
    %c0_i32_9 = arith.constant 0 : i32
    %11 = arith.cmpi ne, %10, %c0_i32_9 : i32
    scf.if %11 {
      %c0_10 = arith.constant 0 : index
      %c0_11 = arith.constant 0 : index
      %12 = vector.load %arg7[%c0_10, %c0_11] : memref<256x256xf32, #tpu.memory_space<vmem>>, vector<256x256xf32>
      %c0_12 = arith.constant 0 : index
      %c0_13 = arith.constant 0 : index
      %13 = vector.load %arg6[%c0_12, %c0_13] : memref<256x256xf32, #tpu.memory_space<vmem>>, vector<256x256xf32>
      tpu.vector_store %arg6[%c0_12, %c0_13], %12 {strides = array<i32>} : memref<256x256xf32, #tpu.memory_space<vmem>>, vector<256x256xf32>,
    } else {
    }
    return
  }
  func.func @transform_0(%arg0: i32, %arg1: i32, %arg2: i32) -> (i32, i32) {
    %c0_i32 = arith.constant 0 : i32
    return %arg0, %arg2 : i32, i32
  }
  func.func @transform_1(%arg0: i32, %arg1: i32, %arg2: i32) -> (i32, i32) {
    %c0_i32 = arith.constant 0 : i32
    return %arg2, %arg1 : i32, i32
  }
  func.func @transform_2(%arg0: i32, %arg1: i32, %arg2: i32) -> (i32, i32) {
    %c0_i32 = arith.constant 0 : i32
    %c0_i32_0 = arith.constant 0 : i32
    return %c0_i32, %arg1 : i32, i32
  }
  func.func @transform_3(%arg0: i32, %arg1: i32, %arg2: i32) -> (i32, i32) {
    %c0_i32 = arith.constant 0 : i32
    return %arg0, %arg1 : i32, i32
  }
}

</mosaic_0001>

<bundles_post_ra>
// kernel: tpu_custom_call.1
= control target key start
LH: loop header
LB: loop body
LE: loop exit
PB: predicated region body
PF: predicated region fallthrough
CT: control target
= control target key end

     0   :  { %8 = vsyncpa [#allocation4], 0  ;;  %s2382_s0 = inlined_call_operand.hbm [shape: f32[256,512], index: 0, kind: input, shape index: {}]   ;;  %s2383_s1 = inlined_call_operand.hbm [shape: f32[512,512], index: 1, kind: input, shape index: {}]   ;;  %s2384_s2 = inlined_call_operand.hbm [shape: f32[1,512], index: 2, kind: input, shape index: {}]   ;;  %s2385_s3 = inlined_call_operand.hbm [shape: f32[256,512], index: 3, kind: output, shape index: {}]  }
   0x1   :  { %9 = vsyncpa [#allocation7], 0 }
   0x2   :  { %11 = vsyncpa [#allocation7 + $0x1], 0 }
   0x3   :  { %12 = vsyncpa [#allocation5], 0 }
   0x4   :  { %14 = vsyncpa [#allocation5 + $0x1], 0  ;;  %s1910_s12 = smov 0   ;;  %s1912_s13 = smov 0  }
   0x5   :  { %s1914_s14 = smov 0   ;;  %s1916_s15 = smov 0  }
   0x6   :  { %s1918_s16 = smov 0   ;;  %s1920_s17 = smov 0  }
   0x7 LB: > { %s35_s18 = sadd.s32 1, %s1873_s16  ;;  %s76_s19 = sadd.s32 1, %s1865_s14  ;;  %s1877_s17 = sphi %s1920_s17, %s20_s17   ;;  %s1873_s16 = sphi %s1918_s16, %s2403_s16   ;;  %s1869_s15 = sphi %s1916_s15, %s2402_s15   ;;  %s1865_s14 = sphi %s1914_s14, %s2401_s14   ;;  %s1861_s13 = sphi %s1912_s13, %s2400_s13   ;;  %s1857_s12 = sphi %s1910_s12, %s2399_s12  }
   0x8   : > { %p37_p0 = scmp.ge.s32.totalorder %s35_s18, 2  ;;  %p83_p1 = scmp.ne.s32.totalorder %s1865_s14, %s1861_s13 }
   0x9   : > { %p84_p2 = scmp.eq.s32.totalorder %s1877_s17, 0  ;;  %p1652_p5 = scmp.lt.s32.totalorder %s1877_s17, 2 }
   0xa   : > { %s2405_s18 = smov (%p37_p0, %s35_s18), 0  ;;  %s186_s22 = sand.u32 1, %s1877_s17  }
   0xb   : > { %p1950_p3 = por %p84_p2, %p83_p1  ;;  %s72_s21 = ssub.s32 %s1873_s16, %s2405_s18 }
   0xc   : > { %p74_p6 = scmp.eq.s32.totalorder %s72_s21, 0  ;;  %s188_s23 = sand.u32 1, %s1865_s14  }
   0xd   : > { %s1607_s25 = sshll.u32 %s188_s23, 10  ;;  %s1623_s26 = sshll.u32 %s1873_s16, 8 }
   0xe   : > { %s1961_s24 = scalar_select %p74_p6, %s1865_s14, %s76_s19  }
   0xf   : > { %s199_s29 = scalar_lea.hbm %s2383_s1, %s1623_s26  ;;  %s190_s30 = scalar_lea.vmem [#allocation6], %s1607_s25 }
  0x10   : > { %s200_s4 = sshll.u32 %s190_s30, 4  ;;  %p1971_p7 = pnand %p1652_p5, %p1950_p3  ;;  %s201_s4 = int_to_ptr.vmem [resolvable:$true] %s200_s4 }
  0x11   : > { %s1975_s6 = scalar_lea.sflag [#allocation7], %s186_s22  ;;  %s1724_s7 = scalar_lea.vmem %s201_s4, 16384 }
  0x12   : > { %p2386_p8 = pneg %p1971_p7  ;;  %p1725_p9 = scmp.ne.s32.totalorder %s201_s4, %s1724_s7 }
  0x13   : > { %s1879_s8 = smov [#allocation6]  }
  0x14   : > { %p1727_p10 = pnand %p1725_p9, %p2386_p8  ;;  %s1729_s9 = sshll.u32 %s1879_s8, 4  ;;  %s1730_s9 = int_to_ptr.vmem [resolvable:$false] %s1729_s9 }
  0x15   : > { %s1731_s10 = scalar_lea.vmem %s1730_s9, 32768  ;;  %p1732_p12 = scmp.lt.s32.totalorder %s201_s4, %s1730_s9 }
  0x16   : > { %p1728_p11 = pneg %p1727_p10  ;;  %p1733_p13 = scmp.lt.s32.totalorder %s1731_s10, %s1724_s7 }
  0x18   : > { %p1734_p0 = por %p1733_p13, %p1732_p12 }
  0x1a   : > { %p1735_p2 = pnand %p1734_p0, %p1728_p11 }
  0x1c   : > { %1738 = shalt.err (!%p1735_p2)
}
  0x1d   : > { %s1880_s11 = smov 512   ;;  %s1881_s19 = smov 256  }
  0x1e   : > { %s1882_s20 = smov 16   ;;  %s1987_s21 = sadd.s32 4294967295, %s1877_s17  }
  0x1f   : > { %1643 = dma.hbm_to_vmem [thread:$0]  (!%p1971_p7), %s199_s29, 16384, %s201_s4, %s1975_s6, %s1880_s11, %s1881_s19, %s1882_s20  }
  0x20   : > { %s1603_s22 = sadd.s32 4294967294, %s1877_s17   ;;  %p89_p3 = scmp.ne.s32.totalorder %s1861_s13, %s1857_s12 }
  0x21   : > { %p90_p5 = scmp.eq.s32.totalorder %s1987_s21, 0  ;;  %p141_p6 = scmp.eq.s32.totalorder %s1987_s21, 1 }
  0x22   : > { %p147_p9 = scmp.eq.s32.totalorder %s1603_s22, 1  ;;  %p1604_p11 = scmp.ge.s32.totalorder %s1877_s17, 1 }
  0x23   : > { %p1996_p10 = por %p90_p5, %p89_p3  ;;  %p2004_p12 = por %p141_p6, %p83_p1 }
  0x24   : > { %p2008_p13 = por %p147_p9, %p89_p3  ;;  %p154_p0 = scmp.lt.s32.totalorder %s1877_s17, 3 }
  0x25   : > { %s2391_s26 = scalar_select %p2004_p12, 1, 0 }
  0x26   : > { %s2392_s27 = scalar_select %p2008_p13, 1, 0 }
  0x27   : > { %p2013_p2 = pnand %p1604_p11, %p154_p0  ;;  %s1883_s29 = smov [#allocation3]  }
  0x28   : > { %s172_s30 = sshll.u32 %s1883_s29, 4  ;;  %s1610_s4 = sshll.u32 %s188_s23, 1  ;;  %s173_s30 = int_to_ptr.vmem [resolvable:$true] %s172_s30 }
  0x29   : > { %p1636_p4 = pneg %p2013_p2  ;;  %s1624_s7 = sshll.u32 %s1873_s16, 5 }
  0x2a   : > { %s214_s8 = scalar_lea.vmem [#allocation8], %s1610_s4  ;;  %s220_s22 = scalar_lea.hbm %s2384_s2, %s1624_s7 }
  0x2b   : > { %s222_s9 = sshll.u32 %s214_s8, 4  ;;  %p2024_p1 = pnand %p1636_p4, %p90_p5  ;;  %s223_s9 = int_to_ptr.vmem [resolvable:$true] %s222_s9 }
  0x2c   : > { %s1750_s23 = scalar_lea.vmem %s173_s30, 16384  ;;  %p1758_p0 = scmp.lt.s32.totalorder %s173_s30, %s173_s30 }
  0x2d   : > { %p1741_p3 = pneg %p2024_p1  ;;  %p1751_p6 = scmp.ne.s32.totalorder %s173_s30, %s1750_s23 }
  0x2e   : > { %p1759_p8 = scmp.lt.s32.totalorder %s1750_s23, %s1750_s23 }
  0x2f   : > { %p1753_p9 = pnand %p1751_p6, %p1741_p3 }
  0x30   : > { %p1760_p13 = por %p1759_p8, %p1758_p0 }
  0x31   : > { %p1754_p11 = pneg %p1753_p9 }
  0x33   : > { %p1761_p12 = pnand %p1760_p13, %p1754_p11 }
  0x35   : > { %1764 = shalt.err (!%p1761_p12)
}
  0x36   : > { %s1884_s29 = smov 32   ;;  %s1778_s7 = scalar_lea.vmem %s223_s9, 32 }
  0x37   : > { %1639 = dma.hbm_to_vmem [thread:$0]  (!%p2024_p1), %s2382_s0, 16384, %s173_s30, [#allocation4], %s1880_s11, %s1880_s11, %s1884_s29  }
  0x38   : > { %p1779_p4 = scmp.ne.s32.totalorder %s223_s9, %s1778_s7  ;;  %p2395_p3 = pneg %p1971_p7 }
  0x39   : > { %s1885_s19 = smov [#allocation8]  }
  0x3a   : > { %p1781_p6 = pnand %p1779_p4, %p2395_p3  ;;  %s1783_s20 = sshll.u32 %s1885_s19, 4  ;;  %s1784_s20 = int_to_ptr.vmem [resolvable:$false] %s1783_s20 }
  0x3b   : > { %s1785_s23 = scalar_lea.vmem %s1784_s20, 64  ;;  %p1786_p8 = scmp.lt.s32.totalorder %s223_s9, %s1784_s20 }
  0x3c   : > { %p1782_p9 = pneg %p1781_p6  ;;  %p1787_p12 = scmp.lt.s32.totalorder %s1785_s23, %s1778_s7 }
  0x3e   : > { %p1788_p13 = por %p1787_p12, %p1786_p8 }
  0x40   : > { %p1789_p11 = pnand %p1788_p13, %p1782_p9 }
  0x42   : > { %1792 = shalt.err (!%p1789_p11)
}
  0x43   : > { %1646 = dma.hbm_to_vmem [thread:$0]  (!%p1971_p7), %s220_s22, 32, %s223_s9, %s1975_s6  }
  0x44   : > { %231 = sbr.rel (%p2013_p2) target bundleno = 483 (0x1e3), region = 32 }
  0x49   : > { %1844 = dma.done.wait (%p90_p5), [#allocation4], 16384  }
  0x4a   : > { %1846 = vsyncadd (%p90_p5), [#allocation4], 4294950912  ;;  %s237_s11 = sand.u32 1, %s1987_s21   ;;  %s2054_s30 = sand.u32 1, %s1861_s13  }
  0x4b   : > { %s1615_s10 = sshll.u32 %s2054_s30, 10  ;;  %s238_s5 = scalar_lea.sflag [#allocation7], %s237_s11 }
  0x4c   : > { %s2057_s29 = scalar_lea.vmem [#allocation6], %s1615_s10 }
  0x4d   : > { %1848 = dma.done.wait (%p1996_p10), %s238_s5, 16416  }
  0x4e   : > { %1850 = vsyncadd (%p1996_p10), %s238_s5, 4294950880  ;;  %v588_v0 = vld [vmem:[%s2057_s29 + $0xf8] sm:$0xff]  ;;  %v587_v2 = vld [vmem:[%s2057_s29 + $0xf0] sm:$0xff]  ;;  %s1616_s6 = sshll.u32 %s2054_s30, 1  ;;  %s1617_s25 = sshll.u32 %s2054_s30, 9 }
  0x4f   : > { %v652_v1 = vld [vmem:[%s2057_s29 + $0x2f8] sm:$0xff]  ;;  %685 = vmatprep.subr.mxu0 %v588_v0  ;;  %v651_v3 = vld [vmem:[%s2057_s29 + $0x2f0] sm:$0xff]  ;;  %v586_v4 = vld [vmem:[%s2057_s29 + $0xe8] sm:$0xff]  ;;  %s250_s21 = scalar_lea.vmem [#allocation8], %s1616_s6  ;;  %s2198_s28 = scalar_lea.vmem [#allocation9], %s1617_s25 }
  0x50   : > { %942 = vmatprep.subr.mxu1 %v652_v1  ;;  %v650_v5 = vld [vmem:[%s2057_s29 + $0x2e8] sm:$0xff]  ;;  %686 = vmatpush1.msra.mxu0 %v587_v2  ;;  %v585_v6 = vld [vmem:[%s2057_s29 + $0xe0] sm:$0xff]  ;;  %v584_v8 = vld [vmem:[%s2057_s29 + $0xd8] sm:$0xff]  ;;  %s1625_s9 = sshll.u32 %s1869_s15, 8  ;;  %s1475_s22 = sshll.u32 %s2198_s28, 4  ;;  %s2331_s22 = int_to_ptr.vmem [resolvable:$true] %s1475_s22 }
  0x51   : > { %943 = vmatpush1.msra.mxu1 %v651_v3  ;;  %v649_v7 = vld [vmem:[%s2057_s29 + $0x2e0] sm:$0xff]  ;;  %687 = vmatprep.subr.mxu0 %v586_v4  ;;  %v648_v9 = vld [vmem:[%s2057_s29 + $0x2d8] sm:$0xff]  ;;  %v583_v10 = vld [vmem:[%s2057_s29 + $0xd0] sm:$0xff]  ;;  %s2329_s7 = scalar_lea.hbm %s2385_s3, %s1625_s9  ;;  %s1459_s15 = scalar_lea.sflag [#allocation5], %s2054_s30 }
  0x52   : > { %944 = vmatprep.subr.mxu1 %v650_v5  ;;  %v647_v11 = vld [vmem:[%s2057_s29 + $0x2d0] sm:$0xff]  ;;  %688 = vmatpush1.msra.mxu0 %v585_v6  ;;  %v582_v12 = vld [vmem:[%s2057_s29 + $0xc8] sm:$0xff]  ;;  %v581_v14 = vld [vmem:[%s2057_s29 + $0xc0] sm:$0xff]  ;;  %s1793_s19 = scalar_lea.vmem %s2331_s22, 8192  ;;  %p2396_p5 = scmp.ne.s32.totalorder %s2391_s26, 0 }
  0x53   : > { %945 = vmatpush1.msra.mxu1 %v649_v7  ;;  %v646_v13 = vld [vmem:[%s2057_s29 + $0x2c8] sm:$0xff]  ;;  %689 = vmatprep.subr.mxu0 %v584_v8  ;;  %v645_v15 = vld [vmem:[%s2057_s29 + $0x2c0] sm:$0xff]  ;;  %v580_v16 = vld [vmem:[%s2057_s29 + $0xb8] sm:$0xff]  ;;  %p1794_p7 = scmp.ne.s32.totalorder %s2331_s22, %s1793_s19  ;;  %s1886_s20 = smov [#allocation9]  }
  0x54   : > { %946 = vmatprep.subr.mxu1 %v648_v9  ;;  %690 = vmatpush1.msra.mxu0 %v583_v10  ;;  %v644_v17 = vld [vmem:[%s2057_s29 + $0x2b8] sm:$0xff]  ;;  %v579_v18 = vld [vmem:[%s2057_s29 + $0xb0] sm:$0xff]  ;;  %v578_v20 = vld [vmem:[%s2057_s29 + $0xa8] sm:$0xff]  ;;  %s1797_s23 = sshll.u32 %s1886_s20, 4  ;;  %s1798_s23 = int_to_ptr.vmem [resolvable:$false] %s1797_s23 }
  0x55   : > { %947 = vmatpush1.msra.mxu1 %v647_v11  ;;  %691 = vmatprep.subr.mxu0 %v582_v12  ;;  %v643_v19 = vld [vmem:[%s2057_s29 + $0x2b0] sm:$0xff]  ;;  %v642_v21 = vld [vmem:[%s2057_s29 + $0x2a8] sm:$0xff]  ;;  %v577_v22 = vld [vmem:[%s2057_s29 + $0xa0] sm:$0xff]  ;;  %p1795_p10 = pnand %p1794_p7, %p2396_p5  ;;  %s1799_s11 = scalar_lea.vmem %s1798_s23, 16384 }
  0x56   : > { %948 = vmatprep.subr.mxu1 %v646_v13  ;;  %692 = vmatpush1.msra.mxu0 %v581_v14  ;;  %v641_v23 = vld [vmem:[%s2057_s29 + $0x2a0] sm:$0xff]  ;;  %v576_v24 = vld [vmem:[%s2057_s29 + $0x98] sm:$0xff]  ;;  %v575_v26 = vld [vmem:[%s2057_s29 + $0x90] sm:$0xff]  ;;  %p1800_p1 = scmp.lt.s32.totalorder %s2331_s22, %s1798_s23  ;;  %p1801_p0 = scmp.lt.s32.totalorder %s1799_s11, %s1793_s19 }
  0x57   : > { %949 = vmatpush1.msra.mxu1 %v645_v15  ;;  %693 = vmatprep.subr.mxu0 %v580_v16  ;;  %v640_v25 = vld [vmem:[%s2057_s29 + $0x298] sm:$0xff]  ;;  %v639_v27 = vld [vmem:[%s2057_s29 + $0x290] sm:$0xff]  ;;  %v574_v28 = vld [vmem:[%s2057_s29 + $0x88] sm:$0xff]  ;;  %p1796_p2 = pneg %p1795_p10 }
  0x58   : > { %950 = vmatprep.subr.mxu1 %v644_v17  ;;  %694 = vmatpush1.msra.mxu0 %v579_v18  ;;  %v638_v29 = vld [vmem:[%s2057_s29 + $0x288] sm:$0xff]  ;;  %v573_v30 = vld [vmem:[%s2057_s29 + $0x80] sm:$0xff]  ;;  %v572_v32 = vld [vmem:[%s2057_s29 + $0x78] sm:$0xff]  ;;  %p1802_p4 = por %p1801_p0, %p1800_p1 }
  0x59   : > { %951 = vmatpush1.msra.mxu1 %v643_v19  ;;  %695 = vmatprep.subr.mxu0 %v578_v20  ;;  %v637_v31 = vld [vmem:[%s2057_s29 + $0x280] sm:$0xff]  ;;  %v636_v33 = vld [vmem:[%s2057_s29 + $0x278] sm:$0xff]  ;;  %v571_v34 = vld [vmem:[%s2057_s29 + $0x70] sm:$0xff] }
  0x5a   : > { %952 = vmatprep.subr.mxu1 %v642_v21  ;;  %696 = vmatpush1.msra.mxu0 %v577_v22  ;;  %v635_v35 = vld [vmem:[%s2057_s29 + $0x270] sm:$0xff]  ;;  %v570_v36 = vld [vmem:[%s2057_s29 + $0x68] sm:$0xff]  ;;  %v569_v38 = vld [vmem:[%s2057_s29 + $0x60] sm:$0xff]  ;;  %p1803_p3 = pnand %p1802_p4, %p1796_p2 }
  0x5b   : > { %953 = vmatpush1.msra.mxu1 %v641_v23  ;;  %697 = vmatprep.subr.mxu0 %v576_v24  ;;  %v634_v37 = vld [vmem:[%s2057_s29 + $0x268] sm:$0xff]  ;;  %v633_v39 = vld [vmem:[%s2057_s29 + $0x260] sm:$0xff]  ;;  %v568_v40 = vld [vmem:[%s2057_s29 + $0x58] sm:$0xff] }
  0x5c   : > { %954 = vmatprep.subr.mxu1 %v640_v25  ;;  %698 = vmatpush1.msra.mxu0 %v575_v26  ;;  %v632_v41 = vld [vmem:[%s2057_s29 + $0x258] sm:$0xff]  ;;  %v567_v42 = vld [vmem:[%s2057_s29 + $0x50] sm:$0xff]  ;;  %v566_v44 = vld [vmem:[%s2057_s29 + $0x48] sm:$0xff] }
  0x5d   : > { %955 = vmatpush1.msra.mxu1 %v639_v27  ;;  %699 = vmatprep.subr.mxu0 %v574_v28  ;;  %v631_v43 = vld [vmem:[%s2057_s29 + $0x250] sm:$0xff]  ;;  %v630_v45 = vld [vmem:[%s2057_s29 + $0x248] sm:$0xff]  ;;  %v565_v46 = vld [vmem:[%s2057_s29 + $0x40] sm:$0xff] }
  0x5e   : > { %956 = vmatprep.subr.mxu1 %v638_v29  ;;  %700 = vmatpush1.msra.mxu0 %v573_v30  ;;  %v629_v47 = vld [vmem:[%s2057_s29 + $0x240] sm:$0xff]  ;;  %v564_v48 = vld [vmem:[%s2057_s29 + $0x38] sm:$0xff]  ;;  %v563_v50 = vld [vmem:[%s2057_s29 + $0x30] sm:$0xff] }
  0x5f   : > { %957 = vmatpush1.msra.mxu1 %v637_v31  ;;  %701 = vmatprep.subr.mxu0 %v572_v32  ;;  %v628_v49 = vld [vmem:[%s2057_s29 + $0x238] sm:$0xff]  ;;  %v627_v51 = vld [vmem:[%s2057_s29 + $0x230] sm:$0xff]  ;;  %v562_v52 = vld [vmem:[%s2057_s29 + $0x28] sm:$0xff] }
  0x60   : > { %958 = vmatprep.subr.mxu1 %v636_v33  ;;  %702 = vmatpush1.msra.mxu0 %v571_v34  ;;  %v626_v53 = vld [vmem:[%s2057_s29 + $0x228] sm:$0xff]  ;;  %v561_v54 = vld [vmem:[%s2057_s29 + $0x20] sm:$0xff]  ;;  %v560_v56 = vld [vmem:[%s2057_s29 + $0x18] sm:$0xff] }
  0x61   : > { %959 = vmatpush1.msra.mxu1 %v635_v35  ;;  %703 = vmatprep.subr.mxu0 %v570_v36  ;;  %v625_v55 = vld [vmem:[%s2057_s29 + $0x220] sm:$0xff]  ;;  %v624_v57 = vld [vmem:[%s2057_s29 + $0x218] sm:$0xff]  ;;  %v559_v58 = vld [vmem:[%s2057_s29 + $0x10] sm:$0xff] }
  0x62   : > { %960 = vmatprep.subr.mxu1 %v634_v37  ;;  %704 = vmatpush1.msra.mxu0 %v569_v38  ;;  %v623_v59 = vld [vmem:[%s2057_s29 + $0x210] sm:$0xff]  ;;  %v558_v60 = vld [vmem:[%s2057_s29 + $0x8] sm:$0xff]  ;;  %v557_v62 = vld [vmem:[%s2057_s29] sm:$0xff] }
  0x63   : > { %961 = vmatpush1.msra.mxu1 %v633_v39  ;;  %705 = vmatprep.subr.mxu0 %v568_v40  ;;  %v622_v61 = vld [vmem:[%s2057_s29 + $0x208] sm:$0xff]  ;;  %v621_v63 = vld [vmem:[%s2057_s29 + $0x200] sm:$0xff]  ;;  %v620_v0 = vld [vmem:[%s2057_s29 + $0x1f8] sm:$0xff] }
  0x64   : > { %962 = vmatprep.subr.mxu1 %v632_v41  ;;  %706 = vmatpush1.msra.mxu0 %v567_v42  ;;  %v684_v1 = vld [vmem:[%s2057_s29 + $0x3f8] sm:$0xff]  ;;  %v619_v2 = vld [vmem:[%s2057_s29 + $0x1f0] sm:$0xff]  ;;  %v618_v4 = vld [vmem:[%s2057_s29 + $0x1e8] sm:$0xff] }
  0x65   : > { %963 = vmatpush1.msra.mxu1 %v631_v43  ;;  %707 = vmatprep.subr.mxu0 %v566_v44  ;;  %v683_v3 = vld [vmem:[%s2057_s29 + $0x3f0] sm:$0xff]  ;;  %v682_v5 = vld [vmem:[%s2057_s29 + $0x3e8] sm:$0xff]  ;;  %v617_v6 = vld [vmem:[%s2057_s29 + $0x1e0] sm:$0xff] }
  0x66   : > { %964 = vmatprep.subr.mxu1 %v630_v45  ;;  %708 = vmatpush1.msra.mxu0 %v565_v46  ;;  %v681_v7 = vld [vmem:[%s2057_s29 + $0x3e0] sm:$0xff]  ;;  %v616_v8 = vld [vmem:[%s2057_s29 + $0x1d8] sm:$0xff]  ;;  %v615_v10 = vld [vmem:[%s2057_s29 + $0x1d0] sm:$0xff] }
  0x67   : > { %965 = vmatpush1.msra.mxu1 %v629_v47  ;;  %709 = vmatprep.subr.mxu0 %v564_v48  ;;  %v680_v9 = vld [vmem:[%s2057_s29 + $0x3d8] sm:$0xff]  ;;  %v679_v11 = vld [vmem:[%s2057_s29 + $0x3d0] sm:$0xff]  ;;  %v614_v12 = vld [vmem:[%s2057_s29 + $0x1c8] sm:$0xff] }
  0x68   : > { %966 = vmatprep.subr.mxu1 %v628_v49  ;;  %710 = vmatpush1.msra.mxu0 %v563_v50  ;;  %v678_v13 = vld [vmem:[%s2057_s29 + $0x3c8] sm:$0xff]  ;;  %v613_v14 = vld [vmem:[%s2057_s29 + $0x1c0] sm:$0xff]  ;;  %v612_v16 = vld [vmem:[%s2057_s29 + $0x1b8] sm:$0xff] }
  0x69   : > { %967 = vmatpush1.msra.mxu1 %v627_v51  ;;  %711 = vmatprep.subr.mxu0 %v562_v52  ;;  %v677_v15 = vld [vmem:[%s2057_s29 + $0x3c0] sm:$0xff]  ;;  %v676_v17 = vld [vmem:[%s2057_s29 + $0x3b8] sm:$0xff]  ;;  %v611_v18 = vld [vmem:[%s2057_s29 + $0x1b0] sm:$0xff] }
  0x6a   : > { %968 = vmatprep.subr.mxu1 %v626_v53  ;;  %712 = vmatpush1.msra.mxu0 %v561_v54  ;;  %v675_v19 = vld [vmem:[%s2057_s29 + $0x3b0] sm:$0xff]  ;;  %v610_v20 = vld [vmem:[%s2057_s29 + $0x1a8] sm:$0xff]  ;;  %v609_v22 = vld [vmem:[%s2057_s29 + $0x1a0] sm:$0xff] }
  0x6b   : > { %969 = vmatpush1.msra.mxu1 %v625_v55  ;;  %713 = vmatprep.subr.mxu0 %v560_v56  ;;  %v674_v21 = vld [vmem:[%s2057_s29 + $0x3a8] sm:$0xff]  ;;  %v673_v23 = vld [vmem:[%s2057_s29 + $0x3a0] sm:$0xff]  ;;  %v608_v24 = vld [vmem:[%s2057_s29 + $0x198] sm:$0xff] }
  0x6c   : > { %970 = vmatprep.subr.mxu1 %v624_v57  ;;  %714 = vmatpush1.msra.mxu0 %v559_v58  ;;  %v672_v25 = vld [vmem:[%s2057_s29 + $0x398] sm:$0xff]  ;;  %v607_v26 = vld [vmem:[%s2057_s29 + $0x190] sm:$0xff]  ;;  %v606_v28 = vld [vmem:[%s2057_s29 + $0x188] sm:$0xff] }
  0x6d   : > { %971 = vmatpush1.msra.mxu1 %v623_v59  ;;  %715 = vmatprep.subr.mxu0 %v558_v60  ;;  %v671_v27 = vld [vmem:[%s2057_s29 + $0x390] sm:$0xff]  ;;  %v670_v29 = vld [vmem:[%s2057_s29 + $0x388] sm:$0xff]  ;;  %v605_v30 = vld [vmem:[%s2057_s29 + $0x180] sm:$0xff] }
  0x6e   : > { %972 = vmatprep.subr.mxu1 %v622_v61  ;;  %716 = vmatpush1.msra.mxu0 %v557_v62  ;;  %v669_v31 = vld [vmem:[%s2057_s29 + $0x380] sm:$0xff]  ;;  %v604_v32 = vld [vmem:[%s2057_s29 + $0x178] sm:$0xff]  ;;  %v603_v34 = vld [vmem:[%s2057_s29 + $0x170] sm:$0xff] }
  0x6f   : > { %973 = vmatpush1.msra.mxu1 %v621_v63  ;;  %717 = vmatprep.subr.mxu0 %v620_v0  ;;  %v668_v33 = vld [vmem:[%s2057_s29 + $0x378] sm:$0xff]  ;;  %v667_v35 = vld [vmem:[%s2057_s29 + $0x370] sm:$0xff]  ;;  %v602_v36 = vld [vmem:[%s2057_s29 + $0x168] sm:$0xff] }
  0x70   : > { %974 = vmatprep.subr.mxu1 %v684_v1  ;;  %718 = vmatpush2.msra.mxu0 %v619_v2  ;;  %v666_v37 = vld [vmem:[%s2057_s29 + $0x368] sm:$0xff]  ;;  %v601_v38 = vld [vmem:[%s2057_s29 + $0x160] sm:$0xff]  ;;  %v600_v40 = vld [vmem:[%s2057_s29 + $0x158] sm:$0xff] }
  0x71   : > { %975 = vmatpush2.msra.mxu1 %v683_v3  ;;  %719 = vmatprep.subr.mxu0 %v618_v4  ;;  %v665_v39 = vld [vmem:[%s2057_s29 + $0x360] sm:$0xff]  ;;  %v664_v41 = vld [vmem:[%s2057_s29 + $0x358] sm:$0xff]  ;;  %v599_v42 = vld [vmem:[%s2057_s29 + $0x150] sm:$0xff] }
  0x72   : > { %976 = vmatprep.subr.mxu1 %v682_v5  ;;  %720 = vmatpush2.msra.mxu0 %v617_v6  ;;  %v663_v43 = vld [vmem:[%s2057_s29 + $0x350] sm:$0xff]  ;;  %v598_v44 = vld [vmem:[%s2057_s29 + $0x148] sm:$0xff]  ;;  %v597_v46 = vld [vmem:[%s2057_s29 + $0x140] sm:$0xff] }
  0x73   : > { %977 = vmatpush2.msra.mxu1 %v681_v7  ;;  %721 = vmatprep.subr.mxu0 %v616_v8  ;;  %v662_v45 = vld [vmem:[%s2057_s29 + $0x348] sm:$0xff]  ;;  %v661_v47 = vld [vmem:[%s2057_s29 + $0x340] sm:$0xff]  ;;  %v596_v48 = vld [vmem:[%s2057_s29 + $0x138] sm:$0xff] }
  0x74   : > { %978 = vmatprep.subr.mxu1 %v680_v9  ;;  %722 = vmatpush2.msra.mxu0 %v615_v10  ;;  %v660_v49 = vld [vmem:[%s2057_s29 + $0x338] sm:$0xff]  ;;  %v595_v50 = vld [vmem:[%s2057_s29 + $0x130] sm:$0xff]  ;;  %v594_v52 = vld [vmem:[%s2057_s29 + $0x128] sm:$0xff] }
  0x75   : > { %979 = vmatpush2.msra.mxu1 %v679_v11  ;;  %723 = vmatprep.subr.mxu0 %v614_v12  ;;  %v659_v51 = vld [vmem:[%s2057_s29 + $0x330] sm:$0xff]  ;;  %v658_v53 = vld [vmem:[%s2057_s29 + $0x328] sm:$0xff]  ;;  %v593_v54 = vld [vmem:[%s2057_s29 + $0x120] sm:$0xff] }
  0x76   : > { %980 = vmatprep.subr.mxu1 %v678_v13  ;;  %724 = vmatpush2.msra.mxu0 %v613_v14  ;;  %v657_v55 = vld [vmem:[%s2057_s29 + $0x320] sm:$0xff]  ;;  %v592_v56 = vld [vmem:[%s2057_s29 + $0x118] sm:$0xff]  ;;  %v591_v58 = vld [vmem:[%s2057_s29 + $0x110] sm:$0xff] }
  0x77   : > { %981 = vmatpush2.msra.mxu1 %v677_v15  ;;  %725 = vmatprep.subr.mxu0 %v612_v16  ;;  %v656_v57 = vld [vmem:[%s2057_s29 + $0x318] sm:$0xff]  ;;  %v655_v59 = vld [vmem:[%s2057_s29 + $0x310] sm:$0xff]  ;;  %v590_v60 = vld [vmem:[%s2057_s29 + $0x108] sm:$0xff] }
  0x78   : > { %982 = vmatprep.subr.mxu1 %v676_v17  ;;  %726 = vmatpush2.msra.mxu0 %v611_v18  ;;  %v654_v61 = vld [vmem:[%s2057_s29 + $0x308] sm:$0xff]  ;;  %v589_v62 = vld [vmem:[%s2057_s29 + $0x100] sm:$0xff]  ;;  %v432_v1 = vld [vmem:[#allocation3 + $0x18] sm:$0xff] }
  0x79   : > { %983 = vmatpush2.msra.mxu1 %v675_v19  ;;  %727 = vmatprep.subr.mxu0 %v610_v20  ;;  %v430_v63 = vld [vmem:[#allocation3 + $0x8] sm:$0xff]  ;;  %v653_v0 = vld [vmem:[%s2057_s29 + $0x300] sm:$0xff]  ;;  %v431_v3 = vld [vmem:[#allocation3 + $0x10] sm:$0xff] }
  0x7a   : > { %984 = vmatprep.subr.mxu1 %v674_v21  ;;  %728 = vmatpush2.msra.mxu0 %v609_v22  ;;  %v429_v2 = vld [vmem:[#allocation3] sm:$0xff]  ;;  %v434_v4 = vld [vmem:[#allocation3 + $0x28] sm:$0xff]  ;;  %v436_v5 = vld [vmem:[#allocation3 + $0x38] sm:$0xff] }
  0x7b   : > { %985 = vmatpush2.msra.mxu1 %v673_v23  ;;  %729 = vmatprep.subr.mxu0 %v608_v24  ;;  %v433_v6 = vld [vmem:[#allocation3 + $0x20] sm:$0xff]  ;;  %v435_v7 = vld [vmem:[#allocation3 + $0x30] sm:$0xff]  ;;  %v438_v8 = vld [vmem:[#allocation3 + $0x48] sm:$0xff] }
  0x7c   : > { %986 = vmatprep.subr.mxu1 %v672_v25  ;;  %730 = vmatpush2.msra.mxu0 %v607_v26  ;;  %v440_v9 = vld [vmem:[#allocation3 + $0x58] sm:$0xff]  ;;  %v437_v10 = vld [vmem:[#allocation3 + $0x40] sm:$0xff]  ;;  %v439_v11 = vld [vmem:[#allocation3 + $0x50] sm:$0xff] }
  0x7d   : > { %987 = vmatpush2.msra.mxu1 %v671_v27  ;;  %731 = vmatprep.subr.mxu0 %v606_v28  ;;  %v442_v12 = vld [vmem:[#allocation3 + $0x68] sm:$0xff]  ;;  %v444_v13 = vld [vmem:[#allocation3 + $0x78] sm:$0xff]  ;;  %v441_v14 = vld [vmem:[#allocation3 + $0x60] sm:$0xff] }
  0x7e   : > { %988 = vmatprep.subr.mxu1 %v670_v29  ;;  %732 = vmatpush2.msra.mxu0 %v605_v30  ;;  %v443_v15 = vld [vmem:[#allocation3 + $0x70] sm:$0xff]  ;;  %v446_v16 = vld [vmem:[#allocation3 + $0x88] sm:$0xff]  ;;  %v448_v17 = vld [vmem:[#allocation3 + $0x98] sm:$0xff] }
  0x7f   : > { %989 = vmatpush2.msra.mxu1 %v669_v31  ;;  %733 = vmatprep.subr.mxu0 %v604_v32  ;;  %v445_v18 = vld [vmem:[#allocation3 + $0x80] sm:$0xff]  ;;  %v447_v19 = vld [vmem:[#allocation3 + $0x90] sm:$0xff]  ;;  %v450_v20 = vld [vmem:[#allocation3 + $0xa8] sm:$0xff] }
  0x80   : > { %990 = vmatprep.subr.mxu1 %v668_v33  ;;  %734 = vmatpush2.msra.mxu0 %v603_v34  ;;  %v452_v21 = vld [vmem:[#allocation3 + $0xb8] sm:$0xff]  ;;  %v449_v22 = vld [vmem:[#allocation3 + $0xa0] sm:$0xff]  ;;  %v451_v23 = vld [vmem:[#allocation3 + $0xb0] sm:$0xff] }
  0x81   : > { %991 = vmatpush2.msra.mxu1 %v667_v35  ;;  %735 = vmatprep.subr.mxu0 %v602_v36  ;;  %v454_v24 = vld [vmem:[#allocation3 + $0xc8] sm:$0xff]  ;;  %v456_v25 = vld [vmem:[#allocation3 + $0xd8] sm:$0xff]  ;;  %v453_v26 = vld [vmem:[#allocation3 + $0xc0] sm:$0xff] }
  0x82   : > { %992 = vmatprep.subr.mxu1 %v666_v37  ;;  %736 = vmatpush2.msra.mxu0 %v601_v38  ;;  %v455_v27 = vld [vmem:[#allocation3 + $0xd0] sm:$0xff]  ;;  %v458_v28 = vld [vmem:[#allocation3 + $0xe8] sm:$0xff]  ;;  %v460_v29 = vld [vmem:[#allocation3 + $0xf8] sm:$0xff] }
  0x83   : > { %993 = vmatpush2.msra.mxu1 %v665_v39  ;;  %737 = vmatprep.subr.mxu0 %v600_v40  ;;  %v457_v30 = vld [vmem:[#allocation3 + $0xe0] sm:$0xff]  ;;  %v459_v31 = vld [vmem:[#allocation3 + $0xf0] sm:$0xff]  ;;  %v462_v32 = vld [vmem:[#allocation3 + $0x108] sm:$0xff] }
  0x84   : > { %994 = vmatprep.subr.mxu1 %v664_v41  ;;  %738 = vmatpush2.msra.mxu0 %v599_v42  ;;  %v464_v33 = vld [vmem:[#allocation3 + $0x118] sm:$0xff]  ;;  %v461_v34 = vld [vmem:[#allocation3 + $0x100] sm:$0xff]  ;;  %v463_v35 = vld [vmem:[#allocation3 + $0x110] sm:$0xff] }
  0x85   : > { %995 = vmatpush2.msra.mxu1 %v663_v43  ;;  %739 = vmatprep.subr.mxu0 %v598_v44  ;;  %v466_v36 = vld [vmem:[#allocation3 + $0x128] sm:$0xff]  ;;  %v468_v37 = vld [vmem:[#allocation3 + $0x138] sm:$0xff]  ;;  %v465_v38 = vld [vmem:[#allocation3 + $0x120] sm:$0xff] }
  0x86   : > { %996 = vmatprep.subr.mxu1 %v662_v45  ;;  %740 = vmatpush2.msra.mxu0 %v597_v46  ;;  %v467_v39 = vld [vmem:[#allocation3 + $0x130] sm:$0xff]  ;;  %v470_v40 = vld [vmem:[#allocation3 + $0x148] sm:$0xff]  ;;  %v472_v41 = vld [vmem:[#allocation3 + $0x158] sm:$0xff] }
  0x87   : > { %997 = vmatpush2.msra.mxu1 %v661_v47  ;;  %741 = vmatprep.subr.mxu0 %v596_v48  ;;  %v469_v42 = vld [vmem:[#allocation3 + $0x140] sm:$0xff]  ;;  %v471_v43 = vld [vmem:[#allocation3 + $0x150] sm:$0xff]  ;;  %v474_v44 = vld [vmem:[#allocation3 + $0x168] sm:$0xff] }
  0x88   : > { %998 = vmatprep.subr.mxu1 %v660_v49  ;;  %742 = vmatpush2.msra.mxu0 %v595_v50  ;;  %v476_v45 = vld [vmem:[#allocation3 + $0x178] sm:$0xff]  ;;  %v473_v46 = vld [vmem:[#allocation3 + $0x160] sm:$0xff]  ;;  %v475_v47 = vld [vmem:[#allocation3 + $0x170] sm:$0xff] }
  0x89   : > { %999 = vmatpush2.msra.mxu1 %v659_v51  ;;  %743 = vmatprep.subr.mxu0 %v594_v52  ;;  %v478_v48 = vld [vmem:[#allocation3 + $0x188] sm:$0xff]  ;;  %v480_v49 = vld [vmem:[#allocation3 + $0x198] sm:$0xff]  ;;  %v477_v50 = vld [vmem:[#allocation3 + $0x180] sm:$0xff] }
  0x8a   : > { %1000 = vmatprep.subr.mxu1 %v658_v53  ;;  %744 = vmatpush2.msra.mxu0 %v593_v54  ;;  %v479_v51 = vld [vmem:[#allocation3 + $0x190] sm:$0xff]  ;;  %v482_v52 = vld [vmem:[#allocation3 + $0x1a8] sm:$0xff]  ;;  %v484_v53 = vld [vmem:[#allocation3 + $0x1b8] sm:$0xff] }
  0x8b   : > { %1001 = vmatpush2.msra.mxu1 %v657_v55  ;;  %745 = vmatprep.subr.mxu0 %v592_v56  ;;  %v481_v54 = vld [vmem:[#allocation3 + $0x1a0] sm:$0xff]  ;;  %v483_v55 = vld [vmem:[#allocation3 + $0x1b0] sm:$0xff]  ;;  %v486_v56 = vld [vmem:[#allocation3 + $0x1c8] sm:$0xff] }
  0x8c   : > { %1002 = vmatprep.subr.mxu1 %v656_v57  ;;  %746 = vmatpush2.msra.mxu0 %v591_v58  ;;  %v488_v57 = vld [vmem:[#allocation3 + $0x1d8] sm:$0xff]  ;;  %v485_v58 = vld [vmem:[#allocation3 + $0x1c0] sm:$0xff] }
  0x8d   : > { %1003 = vmatpush2.msra.mxu1 %v655_v59  ;;  %747 = vmatprep.subr.mxu0 %v590_v60  ;;  %v487_v59 = vld [vmem:[#allocation3 + $0x1d0] sm:$0xff]  ;;  %v490_v60 = vld [vmem:[#allocation3 + $0x1e8] sm:$0xff] }
  0x8e   : > { %1004 = vmatprep.subr.mxu1 %v654_v61  ;;  %748 = vmatpush2.msra.mxu0 %v589_v62  ;;  %v492_v61 = vld [vmem:[#allocation3 + $0x1f8] sm:$0xff]  ;;  %v489_v62 = vld [vmem:[#allocation3 + $0x1e0] sm:$0xff] }
  0x8f   : > { %749 = vmatprep.mubr.f32.mxu0 %v430_v63  ;;  %1005 = vmatpush2.msra.mxu1 %v653_v0  ;;  %v491_v63 = vld [vmem:[#allocation3 + $0x1f0] sm:$0xff]  ;;  %v494_v0 = vld [vmem:[#allocation3 + $0x208] sm:$0xff] }
  0x90   : > { %1006 = vmatprep.mubr.f32.mxu1 %v432_v1  ;;  %750 = vmatmul.mubr.f32.vlgmr.msra.gmra.mxu0 %v429_v2  ;;  %v496_v1 = vld [vmem:[#allocation3 + $0x218] sm:$0xff]  ;;  %v493_v2 = vld [vmem:[#allocation3 + $0x200] sm:$0xff] }
  0x91   : > { %1007 = vmatmul.mubr.f32.vlgmr.msra.gmra.mxu1 %v431_v3  ;;  %755 = vmatprep.mubr.f32.mxu0 %v434_v4  ;;  %v495_v3 = vld [vmem:[#allocation3 + $0x210] sm:$0xff]  ;;  %v498_v4 = vld [vmem:[#allocation3 + $0x228] sm:$0xff] }
  0x92   : > { %1012 = vmatprep.mubr.f32.mxu1 %v436_v5  ;;  %v500_v5 = vld [vmem:[#allocation3 + $0x238] sm:$0xff] }
  0x94   : > { %756 = vmatmul.mubr.f32.gmra.mxu0 %v433_v6  ;;  %v497_v6 = vld [vmem:[#allocation3 + $0x220] sm:$0xff] }
  0x95   : > { %1013 = vmatmul.mubr.f32.gmra.mxu1 %v435_v7  ;;  %761 = vmatprep.mubr.f32.mxu0 %v438_v8  ;;  %v499_v7 = vld [vmem:[#allocation3 + $0x230] sm:$0xff]  ;;  %v502_v8 = vld [vmem:[#allocation3 + $0x248] sm:$0xff] }
  0x96   : > { %1018 = vmatprep.mubr.f32.mxu1 %v440_v9  ;;  %v504_v9 = vld [vmem:[#allocation3 + $0x258] sm:$0xff] }
  0x98   : > { %762 = vmatmul.mubr.f32.gmra.mxu0 %v437_v10  ;;  %v501_v10 = vld [vmem:[#allocation3 + $0x240] sm:$0xff] }
  0x99   : > { %1019 = vmatmul.mubr.f32.gmra.mxu1 %v439_v11  ;;  %767 = vmatprep.mubr.f32.mxu0 %v442_v12  ;;  %v503_v11 = vld [vmem:[#allocation3 + $0x250] sm:$0xff]  ;;  %v506_v12 = vld [vmem:[#allocation3 + $0x268] sm:$0xff] }
  0x9a   : > { %1024 = vmatprep.mubr.f32.mxu1 %v444_v13  ;;  %v508_v13 = vld [vmem:[#allocation3 + $0x278] sm:$0xff] }
  0x9c   : > { %768 = vmatmul.mubr.f32.gmra.mxu0 %v441_v14  ;;  %v505_v14 = vld [vmem:[#allocation3 + $0x260] sm:$0xff] }
  0x9d   : > { %1025 = vmatmul.mubr.f32.gmra.mxu1 %v443_v15  ;;  %773 = vmatprep.mubr.f32.mxu0 %v446_v16  ;;  %v507_v15 = vld [vmem:[#allocation3 + $0x270] sm:$0xff]  ;;  %v510_v16 = vld [vmem:[#allocation3 + $0x288] sm:$0xff] }
  0x9e   : > { %1030 = vmatprep.mubr.f32.mxu1 %v448_v17  ;;  %v512_v17 = vld [vmem:[#allocation3 + $0x298] sm:$0xff] }
  0xa0   : > { %774 = vmatmul.mubr.f32.gmra.mxu0 %v445_v18  ;;  %v509_v18 = vld [vmem:[#allocation3 + $0x280] sm:$0xff] }
  0xa1   : > { %1031 = vmatmul.mubr.f32.gmra.mxu1 %v447_v19  ;;  %779 = vmatprep.mubr.f32.mxu0 %v450_v20  ;;  %v511_v19 = vld [vmem:[#allocation3 + $0x290] sm:$0xff]  ;;  %v514_v20 = vld [vmem:[#allocation3 + $0x2a8] sm:$0xff] }
  0xa2   : > { %1036 = vmatprep.mubr.f32.mxu1 %v452_v21  ;;  %v516_v21 = vld [vmem:[#allocation3 + $0x2b8] sm:$0xff] }
  0xa4   : > { %780 = vmatmul.mubr.f32.gmra.mxu0 %v449_v22  ;;  %v513_v22 = vld [vmem:[#allocation3 + $0x2a0] sm:$0xff] }
  0xa5   : > { %1037 = vmatmul.mubr.f32.gmra.mxu1 %v451_v23  ;;  %785 = vmatprep.mubr.f32.mxu0 %v454_v24  ;;  %v515_v23 = vld [vmem:[#allocation3 + $0x2b0] sm:$0xff]  ;;  %v518_v24 = vld [vmem:[#allocation3 + $0x2c8] sm:$0xff] }
  0xa6   : > { %1042 = vmatprep.mubr.f32.mxu1 %v456_v25  ;;  %v520_v25 = vld [vmem:[#allocation3 + $0x2d8] sm:$0xff] }
  0xa8   : > { %786 = vmatmul.mubr.f32.gmra.mxu0 %v453_v26  ;;  %v517_v26 = vld [vmem:[#allocation3 + $0x2c0] sm:$0xff] }
  0xa9   : > { %1043 = vmatmul.mubr.f32.gmra.mxu1 %v455_v27  ;;  %791 = vmatprep.mubr.f32.mxu0 %v458_v28  ;;  %v519_v27 = vld [vmem:[#allocation3 + $0x2d0] sm:$0xff]  ;;  %v522_v28 = vld [vmem:[#allocation3 + $0x2e8] sm:$0xff] }
  0xaa   : > { %1048 = vmatprep.mubr.f32.mxu1 %v460_v29  ;;  %v524_v29 = vld [vmem:[#allocation3 + $0x2f8] sm:$0xff] }
  0xac   : > { %792 = vmatmul.mubr.f32.gmra.mxu0 %v457_v30  ;;  %v521_v30 = vld [vmem:[#allocation3 + $0x2e0] sm:$0xff] }
  0xad   : > { %1049 = vmatmul.mubr.f32.gmra.mxu1 %v459_v31  ;;  %797 = vmatprep.mubr.f32.mxu0 %v462_v32  ;;  %v523_v31 = vld [vmem:[#allocation3 + $0x2f0] sm:$0xff]  ;;  %v526_v32 = vld [vmem:[#allocation3 + $0x308] sm:$0xff] }
  0xae   : > { %1054 = vmatprep.mubr.f32.mxu1 %v464_v33  ;;  %v528_v33 = vld [vmem:[#allocation3 + $0x318] sm:$0xff] }
  0xb0   : > { %798 = vmatmul.mubr.f32.gmra.mxu0 %v461_v34  ;;  %v525_v34 = vld [vmem:[#allocation3 + $0x300] sm:$0xff] }
  0xb1   : > { %1055 = vmatmul.mubr.f32.gmra.mxu1 %v463_v35  ;;  %803 = vmatprep.mubr.f32.mxu0 %v466_v36  ;;  %v527_v35 = vld [vmem:[#allocation3 + $0x310] sm:$0xff]  ;;  %v530_v36 = vld [vmem:[#allocation3 + $0x328] sm:$0xff] }
  0xb2   : > { %1060 = vmatprep.mubr.f32.mxu1 %v468_v37  ;;  %v532_v37 = vld [vmem:[#allocation3 + $0x338] sm:$0xff] }
  0xb4   : > { %804 = vmatmul.mubr.f32.gmra.mxu0 %v465_v38  ;;  %v529_v38 = vld [vmem:[#allocation3 + $0x320] sm:$0xff] }
  0xb5   : > { %1061 = vmatmul.mubr.f32.gmra.mxu1 %v467_v39  ;;  %809 = vmatprep.mubr.f32.mxu0 %v470_v40  ;;  %v531_v39 = vld [vmem:[#allocation3 + $0x330] sm:$0xff]  ;;  %v534_v40 = vld [vmem:[#allocation3 + $0x348] sm:$0xff] }
  0xb6   : > { %1066 = vmatprep.mubr.f32.mxu1 %v472_v41  ;;  %v536_v41 = vld [vmem:[#allocation3 + $0x358] sm:$0xff] }
  0xb8   : > { %810 = vmatmul.mubr.f32.gmra.mxu0 %v469_v42  ;;  %v533_v42 = vld [vmem:[#allocation3 + $0x340] sm:$0xff] }
  0xb9   : > { %1067 = vmatmul.mubr.f32.gmra.mxu1 %v471_v43  ;;  %815 = vmatprep.mubr.f32.mxu0 %v474_v44  ;;  %v535_v43 = vld [vmem:[#allocation3 + $0x350] sm:$0xff]  ;;  %v538_v44 = vld [vmem:[#allocation3 + $0x368] sm:$0xff] }
  0xba   : > { %1072 = vmatprep.mubr.f32.mxu1 %v476_v45  ;;  %v540_v45 = vld [vmem:[#allocation3 + $0x378] sm:$0xff] }
  0xbc   : > { %816 = vmatmul.mubr.f32.gmra.mxu0 %v473_v46  ;;  %v537_v46 = vld [vmem:[#allocation3 + $0x360] sm:$0xff] }
  0xbd   : > { %1073 = vmatmul.mubr.f32.gmra.mxu1 %v475_v47  ;;  %821 = vmatprep.mubr.f32.mxu0 %v478_v48  ;;  %v539_v47 = vld [vmem:[#allocation3 + $0x370] sm:$0xff]  ;;  %v542_v48 = vld [vmem:[#allocation3 + $0x388] sm:$0xff] }
  0xbe   : > { %1078 = vmatprep.mubr.f32.mxu1 %v480_v49  ;;  %v544_v49 = vld [vmem:[#allocation3 + $0x398] sm:$0xff] }
  0xc0   : > { %822 = vmatmul.mubr.f32.gmra.mxu0 %v477_v50  ;;  %v541_v50 = vld [vmem:[#allocation3 + $0x380] sm:$0xff] }
  0xc1   : > { %1079 = vmatmul.mubr.f32.gmra.mxu1 %v479_v51  ;;  %827 = vmatprep.mubr.f32.mxu0 %v482_v52  ;;  %v543_v51 = vld [vmem:[#allocation3 + $0x390] sm:$0xff]  ;;  %v546_v52 = vld [vmem:[#allocation3 + $0x3a8] sm:$0xff] }
  0xc2   : > { %1084 = vmatprep.mubr.f32.mxu1 %v484_v53  ;;  %v548_v53 = vld [vmem:[#allocation3 + $0x3b8] sm:$0xff] }
  0xc4   : > { %828 = vmatmul.mubr.f32.gmra.mxu0 %v481_v54  ;;  %v545_v54 = vld [vmem:[#allocation3 + $0x3a0] sm:$0xff] }
  0xc5   : > { %1085 = vmatmul.mubr.f32.gmra.mxu1 %v483_v55  ;;  %833 = vmatprep.mubr.f32.mxu0 %v486_v56  ;;  %v547_v55 = vld [vmem:[#allocation3 + $0x3b0] sm:$0xff]  ;;  %v550_v56 = vld [vmem:[#allocation3 + $0x3c8] sm:$0xff] }
  0xc6   : > { %1090 = vmatprep.mubr.f32.mxu1 %v488_v57  ;;  %v552_v57 = vld [vmem:[#allocation3 + $0x3d8] sm:$0xff] }
  0xc8   : > { %834 = vmatmul.mubr.f32.gmra.mxu0 %v485_v58  ;;  %v549_v58 = vld [vmem:[#allocation3 + $0x3c0] sm:$0xff] }
  0xc9   : > { %1091 = vmatmul.mubr.f32.gmra.mxu1 %v487_v59  ;;  %839 = vmatprep.mubr.f32.mxu0 %v490_v60  ;;  %v551_v59 = vld [vmem:[#allocation3 + $0x3d0] sm:$0xff]  ;;  %v554_v60 = vld [vmem:[#allocation3 + $0x3e8] sm:$0xff] }
  0xca   : > { %1096 = vmatprep.mubr.f32.mxu1 %v492_v61  ;;  %v556_v61 = vld [vmem:[#allocation3 + $0x3f8] sm:$0xff] }
  0xcc   : > { %840 = vmatmul.mubr.f32.gmra.mxu0 %v489_v62  ;;  %v553_v62 = vld [vmem:[#allocation3 + $0x3e0] sm:$0xff] }
  0xcd   : > { %1097 = vmatmul.mubr.f32.gmra.mxu1 %v491_v63  ;;  %845 = vmatprep.mubr.f32.mxu0 %v494_v0  ;;  %v555_v63 = vld [vmem:[#allocation3 + $0x3f0] sm:$0xff]  ;;  %v291_v0 = vlaneseq }
  0xce   : > { %1102 = vmatprep.mubr.f32.mxu1 %v496_v1 }
  0xcf   : > { %v292_v1 = vshrl.u32 %v291_v0, 7 }
  0xd0   : > { %846 = vmatmul.mubr.f32.gmra.mxu0 %v493_v2 }
  0xd1   : > { %1103 = vmatmul.mubr.f32.gmra.mxu1 %v495_v3  ;;  %851 = vmatprep.mubr.f32.mxu0 %v498_v4  ;;  %v293_v2 = vsub.s32 0, %v292_v1  ;;  %v289_v3 = vld [vmem:[%s250_s21] sm:$0x3]  ;;  %v297_v4 = vsub.s32 1, %v292_v1 }
  0xd2   : > { %1108 = vmatprep.mubr.f32.mxu1 %v500_v5 }
  0xd3   : > { %v2193_v5 = vrot.slane %v289_v3, %v293_v2 }
  0xd4   : > { %852 = vmatmul.mubr.f32.gmra.mxu0 %v497_v6 }
  0xd5   : > { %1109 = vmatmul.mubr.f32.gmra.mxu1 %v499_v7  ;;  %857 = vmatprep.mubr.f32.mxu0 %v502_v8 }
  0xd6   : > { %1114 = vmatprep.mubr.f32.mxu1 %v504_v9  ;;  %v2195_v9 = vrot.slane %v289_v3, %v297_v4 }
  0xd8   : > { %858 = vmatmul.mubr.f32.gmra.mxu0 %v501_v10 }
  0xd9   : > { %1115 = vmatmul.mubr.f32.gmra.mxu1 %v503_v11  ;;  %863 = vmatprep.mubr.f32.mxu0 %v506_v12 }
  0xda   : > { %1120 = vmatprep.mubr.f32.mxu1 %v508_v13 }
  0xdc   : > { %864 = vmatmul.mubr.f32.gmra.mxu0 %v505_v14 }
  0xdd   : > { %1121 = vmatmul.mubr.f32.gmra.mxu1 %v507_v15  ;;  %869 = vmatprep.mubr.f32.mxu0 %v510_v16 }
  0xde   : > { %1126 = vmatprep.mubr.f32.mxu1 %v512_v17 }
  0xe0   : > { %870 = vmatmul.mubr.f32.gmra.mxu0 %v509_v18 }
  0xe1   : > { %1127 = vmatmul.mubr.f32.gmra.mxu1 %v511_v19  ;;  %875 = vmatprep.mubr.f32.mxu0 %v514_v20 }
  0xe2   : > { %1132 = vmatprep.mubr.f32.mxu1 %v516_v21 }
  0xe4   : > { %876 = vmatmul.mubr.f32.gmra.mxu0 %v513_v22 }
  0xe5   : > { %1133 = vmatmul.mubr.f32.gmra.mxu1 %v515_v23  ;;  %881 = vmatprep.mubr.f32.mxu0 %v518_v24 }
  0xe6   : > { %1138 = vmatprep.mubr.f32.mxu1 %v520_v25 }
  0xe8   : > { %882 = vmatmul.mubr.f32.gmra.mxu0 %v517_v26 }
  0xe9   : > { %1139 = vmatmul.mubr.f32.gmra.mxu1 %v519_v27  ;;  %887 = vmatprep.mubr.f32.mxu0 %v522_v28 }
  0xea   : > { %1144 = vmatprep.mubr.f32.mxu1 %v524_v29 }
  0xec   : > { %888 = vmatmul.mubr.f32.gmra.mxu0 %v521_v30 }
  0xed   : > { %1145 = vmatmul.mubr.f32.gmra.mxu1 %v523_v31  ;;  %893 = vmatprep.mubr.f32.mxu0 %v526_v32 }
  0xee   : > { %1150 = vmatprep.mubr.f32.mxu1 %v528_v33 }
  0xf0   : > { %894 = vmatmul.mubr.f32.gmra.mxu0 %v525_v34 }
  0xf1   : > { %1151 = vmatmul.mubr.f32.gmra.mxu1 %v527_v35  ;;  %899 = vmatprep.mubr.f32.mxu0 %v530_v36 }
  0xf2   : > { %1156 = vmatprep.mubr.f32.mxu1 %v532_v37 }
  0xf4   : > { %900 = vmatmul.mubr.f32.gmra.mxu0 %v529_v38 }
  0xf5   : > { %1157 = vmatmul.mubr.f32.gmra.mxu1 %v531_v39  ;;  %905 = vmatprep.mubr.f32.mxu0 %v534_v40 }
  0xf6   : > { %1162 = vmatprep.mubr.f32.mxu1 %v536_v41 }
  0xf8   : > { %906 = vmatmul.mubr.f32.gmra.mxu0 %v533_v42 }
  0xf9   : > { %1163 = vmatmul.mubr.f32.gmra.mxu1 %v535_v43  ;;  %911 = vmatprep.mubr.f32.mxu0 %v538_v44 }
  0xfa   : > { %1168 = vmatprep.mubr.f32.mxu1 %v540_v45 }
  0xfc   : > { %912 = vmatmul.mubr.f32.gmra.mxu0 %v537_v46 }
  0xfd   : > { %1169 = vmatmul.mubr.f32.gmra.mxu1 %v539_v47  ;;  %917 = vmatprep.mubr.f32.mxu0 %v542_v48 }
  0xfe   : > { %1174 = vmatprep.mubr.f32.mxu1 %v544_v49 }
 0x100   : > { %918 = vmatmul.mubr.f32.gmra.mxu0 %v541_v50 }
 0x101   : > { %1175 = vmatmul.mubr.f32.gmra.mxu1 %v543_v51  ;;  %923 = vmatprep.mubr.f32.mxu0 %v546_v52 }
 0x102   : > { %1180 = vmatprep.mubr.f32.mxu1 %v548_v53 }
 0x104   : > { %924 = vmatmul.mubr.f32.gmra.mxu0 %v545_v54 }
 0x105   : > { %1181 = vmatmul.mubr.f32.gmra.mxu1 %v547_v55  ;;  %929 = vmatprep.mubr.f32.mxu0 %v550_v56 }
 0x106   : > { %1186 = vmatprep.mubr.f32.mxu1 %v552_v57 }
 0x108   : > { %930 = vmatmul.mubr.f32.gmra.mxu0 %v549_v58 }
 0x109   : > { %1187 = vmatmul.mubr.f32.gmra.mxu1 %v551_v59  ;;  %935 = vmatprep.mubr.f32.mxu0 %v554_v60 }
 0x10a   : > { %1192 = vmatprep.mubr.f32.mxu1 %v556_v61 }
 0x10c   : > { %936 = vmatmul.mubr.f32.gmra.mxu0 %v553_v62 }
 0x10d   : > { %1193 = vmatmul.mubr.f32.gmra.mxu1 %v555_v63 }
 0x150   : > { %v751_v6 = vpop.f32.mrf.mxu0 }
 0x151   : > { %v1008_v7 = vpop.f32.mrf.mxu1 }
 0x152   : > { %v1009_v8 = vadd.f32 %v1008_v7, %v751_v6  ;;  %v753_v10 = vpop.f32.mrf.mxu0 }
 0x153   : > { %v1010_v11 = vpop.f32.mrf.mxu1 }
 0x154   : > { %v1199_v12 = vadd.f32 %v1009_v8, %v2193_v5  ;;  %v1011_v13 = vadd.f32 %v1010_v11, %v753_v10  ;;  %v757_v14 = vpop.f32.mrf.mxu0 }
 0x155   : > { %v1014_v15 = vpop.f32.mrf.mxu1 }
 0x156   : > { %1394 = vst [vmem:[%s2198_s28] sm:$0xff] %v1199_v12  ;;  %v1200_v16 = vadd.f32 %v1011_v13, %v2195_v9  ;;  %v1015_v17 = vadd.f32 %v1014_v15, %v757_v14  ;;  %v759_v18 = vpop.f32.mrf.mxu0 }
 0x157   : > { %v1016_v19 = vpop.f32.mrf.mxu1 }
 0x158   : > { %1395 = vst [vmem:[%s2198_s28 + $0x8] sm:$0xff] %v1200_v16  ;;  %v1201_v20 = vadd.f32 %v1015_v17, %v2193_v5  ;;  %v1017_v21 = vadd.f32 %v1016_v19, %v759_v18  ;;  %v763_v22 = vpop.f32.mrf.mxu0 }
 0x159   : > { %v1020_v23 = vpop.f32.mrf.mxu1 }
 0x15a   : > { %1396 = vst [vmem:[%s2198_s28 + $0x10] sm:$0xff] %v1201_v20  ;;  %v1202_v24 = vadd.f32 %v1017_v21, %v2195_v9  ;;  %v1021_v25 = vadd.f32 %v1020_v23, %v763_v22  ;;  %v765_v26 = vpop.f32.mrf.mxu0 }
 0x15b   : > { %v1022_v27 = vpop.f32.mrf.mxu1 }
 0x15c   : > { %1397 = vst [vmem:[%s2198_s28 + $0x18] sm:$0xff] %v1202_v24  ;;  %v1203_v28 = vadd.f32 %v1021_v25, %v2193_v5  ;;  %v1023_v29 = vadd.f32 %v1022_v27, %v765_v26  ;;  %v769_v30 = vpop.f32.mrf.mxu0 }
 0x15d   : > { %v1026_v31 = vpop.f32.mrf.mxu1 }
 0x15e   : > { %1398 = vst [vmem:[%s2198_s28 + $0x20] sm:$0xff] %v1203_v28  ;;  %v1204_v32 = vadd.f32 %v1023_v29, %v2195_v9  ;;  %v1027_v33 = vadd.f32 %v1026_v31, %v769_v30  ;;  %v771_v34 = vpop.f32.mrf.mxu0 }
 0x15f   : > { %v1028_v35 = vpop.f32.mrf.mxu1 }
 0x160   : > { %1399 = vst [vmem:[%s2198_s28 + $0x28] sm:$0xff] %v1204_v32  ;;  %v1205_v36 = vadd.f32 %v1027_v33, %v2193_v5  ;;  %v1029_v37 = vadd.f32 %v1028_v35, %v771_v34  ;;  %v775_v38 = vpop.f32.mrf.mxu0 }
 0x161   : > { %v1032_v39 = vpop.f32.mrf.mxu1 }
 0x162   : > { %1400 = vst [vmem:[%s2198_s28 + $0x30] sm:$0xff] %v1205_v36  ;;  %v1206_v40 = vadd.f32 %v1029_v37, %v2195_v9  ;;  %v1033_v41 = vadd.f32 %v1032_v39, %v775_v38  ;;  %v777_v42 = vpop.f32.mrf.mxu0 }
 0x163   : > { %v1034_v43 = vpop.f32.mrf.mxu1 }
 0x164   : > { %1401 = vst [vmem:[%s2198_s28 + $0x38] sm:$0xff] %v1206_v40  ;;  %v1207_v44 = vadd.f32 %v1033_v41, %v2193_v5  ;;  %v1035_v45 = vadd.f32 %v1034_v43, %v777_v42  ;;  %v781_v46 = vpop.f32.mrf.mxu0 }
 0x165   : > { %v1038_v47 = vpop.f32.mrf.mxu1 }
 0x166   : > { %1402 = vst [vmem:[%s2198_s28 + $0x40] sm:$0xff] %v1207_v44  ;;  %v1208_v48 = vadd.f32 %v1035_v45, %v2195_v9  ;;  %v1039_v49 = vadd.f32 %v1038_v47, %v781_v46  ;;  %v783_v50 = vpop.f32.mrf.mxu0 }
 0x167   : > { %v1040_v51 = vpop.f32.mrf.mxu1 }
 0x168   : > { %1403 = vst [vmem:[%s2198_s28 + $0x48] sm:$0xff] %v1208_v48  ;;  %v1209_v52 = vadd.f32 %v1039_v49, %v2193_v5  ;;  %v1041_v53 = vadd.f32 %v1040_v51, %v783_v50  ;;  %v787_v54 = vpop.f32.mrf.mxu0 }
 0x169   : > { %v1044_v55 = vpop.f32.mrf.mxu1 }
 0x16a   : > { %1404 = vst [vmem:[%s2198_s28 + $0x50] sm:$0xff] %v1209_v52  ;;  %v1210_v56 = vadd.f32 %v1041_v53, %v2195_v9  ;;  %v1045_v57 = vadd.f32 %v1044_v55, %v787_v54  ;;  %v789_v58 = vpop.f32.mrf.mxu0 }
 0x16b   : > { %v1046_v59 = vpop.f32.mrf.mxu1 }
 0x16c   : > { %1405 = vst [vmem:[%s2198_s28 + $0x58] sm:$0xff] %v1210_v56  ;;  %v1211_v60 = vadd.f32 %v1045_v57, %v2193_v5  ;;  %v1047_v61 = vadd.f32 %v1046_v59, %v789_v58  ;;  %v793_v62 = vpop.f32.mrf.mxu0 }
 0x16d   : > { %v1050_v63 = vpop.f32.mrf.mxu1 }
 0x16e   : > { %1406 = vst [vmem:[%s2198_s28 + $0x60] sm:$0xff] %v1211_v60  ;;  %v1212_v0 = vadd.f32 %v1047_v61, %v2195_v9  ;;  %v1051_v1 = vadd.f32 %v1050_v63, %v793_v62  ;;  %v795_v2 = vpop.f32.mrf.mxu0 }
 0x16f   : > { %v1052_v3 = vpop.f32.mrf.mxu1 }
 0x170   : > { %1407 = vst [vmem:[%s2198_s28 + $0x68] sm:$0xff] %v1212_v0  ;;  %v1213_v4 = vadd.f32 %v1051_v1, %v2193_v5  ;;  %v1053_v6 = vadd.f32 %v1052_v3, %v795_v2  ;;  %v799_v7 = vpop.f32.mrf.mxu0 }
 0x171   : > { %v1056_v8 = vpop.f32.mrf.mxu1 }
 0x172   : > { %1408 = vst [vmem:[%s2198_s28 + $0x70] sm:$0xff] %v1213_v4  ;;  %v1214_v10 = vadd.f32 %v1053_v6, %v2195_v9  ;;  %v1057_v11 = vadd.f32 %v1056_v8, %v799_v7  ;;  %v801_v12 = vpop.f32.mrf.mxu0 }
 0x173   : > { %v1058_v13 = vpop.f32.mrf.mxu1 }
 0x174   : > { %1409 = vst [vmem:[%s2198_s28 + $0x78] sm:$0xff] %v1214_v10  ;;  %v1215_v14 = vadd.f32 %v1057_v11, %v2193_v5  ;;  %v1059_v15 = vadd.f32 %v1058_v13, %v801_v12  ;;  %v805_v16 = vpop.f32.mrf.mxu0 }
 0x175   : > { %v1062_v17 = vpop.f32.mrf.mxu1 }
 0x176   : > { %1410 = vst [vmem:[%s2198_s28 + $0x80] sm:$0xff] %v1215_v14  ;;  %v1216_v18 = vadd.f32 %v1059_v15, %v2195_v9  ;;  %v1063_v19 = vadd.f32 %v1062_v17, %v805_v16  ;;  %v807_v20 = vpop.f32.mrf.mxu0 }
 0x177   : > { %v1064_v21 = vpop.f32.mrf.mxu1 }
 0x178   : > { %1411 = vst [vmem:[%s2198_s28 + $0x88] sm:$0xff] %v1216_v18  ;;  %v1217_v22 = vadd.f32 %v1063_v19, %v2193_v5  ;;  %v1065_v23 = vadd.f32 %v1064_v21, %v807_v20  ;;  %v811_v24 = vpop.f32.mrf.mxu0 }
 0x179   : > { %v1068_v25 = vpop.f32.mrf.mxu1 }
 0x17a   : > { %1412 = vst [vmem:[%s2198_s28 + $0x90] sm:$0xff] %v1217_v22  ;;  %v1218_v26 = vadd.f32 %v1065_v23, %v2195_v9  ;;  %v1069_v27 = vadd.f32 %v1068_v25, %v811_v24  ;;  %v813_v28 = vpop.f32.mrf.mxu0 }
 0x17b   : > { %v1070_v29 = vpop.f32.mrf.mxu1 }
 0x17c   : > { %1413 = vst [vmem:[%s2198_s28 + $0x98] sm:$0xff] %v1218_v26  ;;  %v1219_v30 = vadd.f32 %v1069_v27, %v2193_v5  ;;  %v1071_v31 = vadd.f32 %v1070_v29, %v813_v28  ;;  %v817_v32 = vpop.f32.mrf.mxu0 }
 0x17d   : > { %v1074_v33 = vpop.f32.mrf.mxu1 }
 0x17e   : > { %1414 = vst [vmem:[%s2198_s28 + $0xa0] sm:$0xff] %v1219_v30  ;;  %v1220_v34 = vadd.f32 %v1071_v31, %v2195_v9  ;;  %v1075_v35 = vadd.f32 %v1074_v33, %v817_v32  ;;  %v819_v36 = vpop.f32.mrf.mxu0 }
 0x17f   : > { %v1076_v37 = vpop.f32.mrf.mxu1 }
 0x180   : > { %1415 = vst [vmem:[%s2198_s28 + $0xa8] sm:$0xff] %v1220_v34  ;;  %v1221_v38 = vadd.f32 %v1075_v35, %v2193_v5  ;;  %v1077_v39 = vadd.f32 %v1076_v37, %v819_v36  ;;  %v823_v40 = vpop.f32.mrf.mxu0 }
 0x181   : > { %v1080_v41 = vpop.f32.mrf.mxu1 }
 0x182   : > { %1416 = vst [vmem:[%s2198_s28 + $0xb0] sm:$0xff] %v1221_v38  ;;  %v1222_v42 = vadd.f32 %v1077_v39, %v2195_v9  ;;  %v1081_v43 = vadd.f32 %v1080_v41, %v823_v40  ;;  %v825_v44 = vpop.f32.mrf.mxu0 }
 0x183   : > { %v1082_v45 = vpop.f32.mrf.mxu1 }
 0x184   : > { %1417 = vst [vmem:[%s2198_s28 + $0xb8] sm:$0xff] %v1222_v42  ;;  %v1223_v46 = vadd.f32 %v1081_v43, %v2193_v5  ;;  %v1083_v47 = vadd.f32 %v1082_v45, %v825_v44  ;;  %v829_v48 = vpop.f32.mrf.mxu0 }
 0x185   : > { %v1086_v49 = vpop.f32.mrf.mxu1 }
 0x186   : > { %1418 = vst [vmem:[%s2198_s28 + $0xc0] sm:$0xff] %v1223_v46  ;;  %v1224_v50 = vadd.f32 %v1083_v47, %v2195_v9  ;;  %v1087_v51 = vadd.f32 %v1086_v49, %v829_v48  ;;  %v831_v52 = vpop.f32.mrf.mxu0 }
 0x187   : > { %v1088_v53 = vpop.f32.mrf.mxu1 }
 0x188   : > { %1419 = vst [vmem:[%s2198_s28 + $0xc8] sm:$0xff] %v1224_v50  ;;  %v1225_v54 = vadd.f32 %v1087_v51, %v2193_v5  ;;  %v1089_v55 = vadd.f32 %v1088_v53, %v831_v52  ;;  %v835_v56 = vpop.f32.mrf.mxu0 }
 0x189   : > { %v1092_v57 = vpop.f32.mrf.mxu1 }
 0x18a   : > { %1420 = vst [vmem:[%s2198_s28 + $0xd0] sm:$0xff] %v1225_v54  ;;  %v1226_v58 = vadd.f32 %v1089_v55, %v2195_v9  ;;  %v1093_v59 = vadd.f32 %v1092_v57, %v835_v56  ;;  %v837_v60 = vpop.f32.mrf.mxu0 }
 0x18b   : > { %v1094_v61 = vpop.f32.mrf.mxu1 }
 0x18c   : > { %1421 = vst [vmem:[%s2198_s28 + $0xd8] sm:$0xff] %v1226_v58  ;;  %v1227_v62 = vadd.f32 %v1093_v59, %v2193_v5  ;;  %v1095_v63 = vadd.f32 %v1094_v61, %v837_v60  ;;  %v841_v0 = vpop.f32.mrf.mxu0 }
 0x18d   : > { %v1098_v1 = vpop.f32.mrf.mxu1 }
 0x18e   : > { %1422 = vst [vmem:[%s2198_s28 + $0xe0] sm:$0xff] %v1227_v62  ;;  %v1228_v2 = vadd.f32 %v1095_v63, %v2195_v9  ;;  %v1099_v3 = vadd.f32 %v1098_v1, %v841_v0  ;;  %v843_v4 = vpop.f32.mrf.mxu0 }
 0x18f   : > { %v1100_v6 = vpop.f32.mrf.mxu1 }
 0x190   : > { %1423 = vst [vmem:[%s2198_s28 + $0xe8] sm:$0xff] %v1228_v2  ;;  %v1229_v7 = vadd.f32 %v1099_v3, %v2193_v5  ;;  %v1101_v8 = vadd.f32 %v1100_v6, %v843_v4  ;;  %v847_v10 = vpop.f32.mrf.mxu0 }
 0x191   : > { %v1104_v11 = vpop.f32.mrf.mxu1 }
 0x192   : > { %1424 = vst [vmem:[%s2198_s28 + $0xf0] sm:$0xff] %v1229_v7  ;;  %v1230_v12 = vadd.f32 %v1101_v8, %v2195_v9  ;;  %v1105_v13 = vadd.f32 %v1104_v11, %v847_v10  ;;  %v849_v14 = vpop.f32.mrf.mxu0 }
 0x193   : > { %v1106_v15 = vpop.f32.mrf.mxu1 }
 0x194   : > { %1425 = vst [vmem:[%s2198_s28 + $0xf8] sm:$0xff] %v1230_v12  ;;  %v1231_v16 = vadd.f32 %v1105_v13, %v2193_v5  ;;  %v1107_v17 = vadd.f32 %v1106_v15, %v849_v14  ;;  %v853_v18 = vpop.f32.mrf.mxu0 }
 0x195   : > { %v1110_v19 = vpop.f32.mrf.mxu1 }
 0x196   : > { %1426 = vst [vmem:[%s2198_s28 + $0x100] sm:$0xff] %v1231_v16  ;;  %v1232_v20 = vadd.f32 %v1107_v17, %v2195_v9  ;;  %v1111_v21 = vadd.f32 %v1110_v19, %v853_v18  ;;  %v855_v22 = vpop.f32.mrf.mxu0 }
 0x197   : > { %v1112_v23 = vpop.f32.mrf.mxu1 }
 0x198   : > { %1427 = vst [vmem:[%s2198_s28 + $0x108] sm:$0xff] %v1232_v20  ;;  %v1233_v24 = vadd.f32 %v1111_v21, %v2193_v5  ;;  %v1113_v25 = vadd.f32 %v1112_v23, %v855_v22  ;;  %v859_v26 = vpop.f32.mrf.mxu0 }
 0x199   : > { %v1116_v27 = vpop.f32.mrf.mxu1 }
 0x19a   : > { %1428 = vst [vmem:[%s2198_s28 + $0x110] sm:$0xff] %v1233_v24  ;;  %v1234_v28 = vadd.f32 %v1113_v25, %v2195_v9  ;;  %v1117_v29 = vadd.f32 %v1116_v27, %v859_v26  ;;  %v861_v30 = vpop.f32.mrf.mxu0 }
 0x19b   : > { %v1118_v31 = vpop.f32.mrf.mxu1 }
 0x19c   : > { %1429 = vst [vmem:[%s2198_s28 + $0x118] sm:$0xff] %v1234_v28  ;;  %v1235_v32 = vadd.f32 %v1117_v29, %v2193_v5  ;;  %v1119_v33 = vadd.f32 %v1118_v31, %v861_v30  ;;  %v865_v34 = vpop.f32.mrf.mxu0 }
 0x19d   : > { %v1122_v35 = vpop.f32.mrf.mxu1 }
 0x19e   : > { %1430 = vst [vmem:[%s2198_s28 + $0x120] sm:$0xff] %v1235_v32  ;;  %v1236_v36 = vadd.f32 %v1119_v33, %v2195_v9  ;;  %v1123_v37 = vadd.f32 %v1122_v35, %v865_v34  ;;  %v867_v38 = vpop.f32.mrf.mxu0 }
 0x19f   : > { %v1124_v39 = vpop.f32.mrf.mxu1 }
 0x1a0   : > { %1431 = vst [vmem:[%s2198_s28 + $0x128] sm:$0xff] %v1236_v36  ;;  %v1237_v40 = vadd.f32 %v1123_v37, %v2193_v5  ;;  %v1125_v41 = vadd.f32 %v1124_v39, %v867_v38  ;;  %v871_v42 = vpop.f32.mrf.mxu0 }
 0x1a1   : > { %v1128_v43 = vpop.f32.mrf.mxu1 }
 0x1a2   : > { %1432 = vst [vmem:[%s2198_s28 + $0x130] sm:$0xff] %v1237_v40  ;;  %v1238_v44 = vadd.f32 %v1125_v41, %v2195_v9  ;;  %v1129_v45 = vadd.f32 %v1128_v43, %v871_v42  ;;  %v873_v46 = vpop.f32.mrf.mxu0 }
 0x1a3   : > { %v1130_v47 = vpop.f32.mrf.mxu1 }
 0x1a4   : > { %1433 = vst [vmem:[%s2198_s28 + $0x138] sm:$0xff] %v1238_v44  ;;  %v1239_v48 = vadd.f32 %v1129_v45, %v2193_v5  ;;  %v1131_v49 = vadd.f32 %v1130_v47, %v873_v46  ;;  %v877_v50 = vpop.f32.mrf.mxu0 }
 0x1a5   : > { %v1134_v51 = vpop.f32.mrf.mxu1 }
 0x1a6   : > { %1434 = vst [vmem:[%s2198_s28 + $0x140] sm:$0xff] %v1239_v48  ;;  %v1240_v52 = vadd.f32 %v1131_v49, %v2195_v9  ;;  %v1135_v53 = vadd.f32 %v1134_v51, %v877_v50  ;;  %v879_v54 = vpop.f32.mrf.mxu0 }
 0x1a7   : > { %v1136_v55 = vpop.f32.mrf.mxu1 }
 0x1a8   : > { %1435 = vst [vmem:[%s2198_s28 + $0x148] sm:$0xff] %v1240_v52  ;;  %v1241_v56 = vadd.f32 %v1135_v53, %v2193_v5  ;;  %v1137_v57 = vadd.f32 %v1136_v55, %v879_v54  ;;  %v883_v58 = vpop.f32.mrf.mxu0 }
 0x1a9   : > { %v1140_v59 = vpop.f32.mrf.mxu1 }
 0x1aa   : > { %1436 = vst [vmem:[%s2198_s28 + $0x150] sm:$0xff] %v1241_v56  ;;  %v1242_v60 = vadd.f32 %v1137_v57, %v2195_v9  ;;  %v1141_v61 = vadd.f32 %v1140_v59, %v883_v58  ;;  %v885_v62 = vpop.f32.mrf.mxu0 }
 0x1ab   : > { %v1142_v63 = vpop.f32.mrf.mxu1 }
 0x1ac   : > { %1437 = vst [vmem:[%s2198_s28 + $0x158] sm:$0xff] %v1242_v60  ;;  %v1243_v0 = vadd.f32 %v1141_v61, %v2193_v5  ;;  %v1143_v1 = vadd.f32 %v1142_v63, %v885_v62  ;;  %v889_v2 = vpop.f32.mrf.mxu0 }
 0x1ad   : > { %v1146_v3 = vpop.f32.mrf.mxu1 }
 0x1ae   : > { %1438 = vst [vmem:[%s2198_s28 + $0x160] sm:$0xff] %v1243_v0  ;;  %v1244_v4 = vadd.f32 %v1143_v1, %v2195_v9  ;;  %v1147_v6 = vadd.f32 %v1146_v3, %v889_v2  ;;  %v891_v7 = vpop.f32.mrf.mxu0 }
 0x1af   : > { %v1148_v8 = vpop.f32.mrf.mxu1 }
 0x1b0   : > { %1439 = vst [vmem:[%s2198_s28 + $0x168] sm:$0xff] %v1244_v4  ;;  %v1245_v10 = vadd.f32 %v1147_v6, %v2193_v5  ;;  %v1149_v11 = vadd.f32 %v1148_v8, %v891_v7  ;;  %v895_v12 = vpop.f32.mrf.mxu0 }
 0x1b1   : > { %v1152_v13 = vpop.f32.mrf.mxu1 }
 0x1b2   : > { %1440 = vst [vmem:[%s2198_s28 + $0x170] sm:$0xff] %v1245_v10  ;;  %v1246_v14 = vadd.f32 %v1149_v11, %v2195_v9  ;;  %v1153_v15 = vadd.f32 %v1152_v13, %v895_v12  ;;  %v897_v16 = vpop.f32.mrf.mxu0 }
 0x1b3   : > { %v1154_v17 = vpop.f32.mrf.mxu1 }
 0x1b4   : > { %1441 = vst [vmem:[%s2198_s28 + $0x178] sm:$0xff] %v1246_v14  ;;  %v1247_v18 = vadd.f32 %v1153_v15, %v2193_v5  ;;  %v1155_v19 = vadd.f32 %v1154_v17, %v897_v16  ;;  %v901_v20 = vpop.f32.mrf.mxu0 }
 0x1b5   : > { %v1158_v21 = vpop.f32.mrf.mxu1 }
 0x1b6   : > { %1442 = vst [vmem:[%s2198_s28 + $0x180] sm:$0xff] %v1247_v18  ;;  %v1248_v22 = vadd.f32 %v1155_v19, %v2195_v9  ;;  %v1159_v23 = vadd.f32 %v1158_v21, %v901_v20  ;;  %v903_v24 = vpop.f32.mrf.mxu0 }
 0x1b7   : > { %v1160_v25 = vpop.f32.mrf.mxu1 }
 0x1b8   : > { %1443 = vst [vmem:[%s2198_s28 + $0x188] sm:$0xff] %v1248_v22  ;;  %v1249_v26 = vadd.f32 %v1159_v23, %v2193_v5  ;;  %v1161_v27 = vadd.f32 %v1160_v25, %v903_v24  ;;  %v907_v28 = vpop.f32.mrf.mxu0 }
 0x1b9   : > { %v1164_v29 = vpop.f32.mrf.mxu1 }
 0x1ba   : > { %1444 = vst [vmem:[%s2198_s28 + $0x190] sm:$0xff] %v1249_v26  ;;  %v1250_v30 = vadd.f32 %v1161_v27, %v2195_v9  ;;  %v1165_v31 = vadd.f32 %v1164_v29, %v907_v28  ;;  %v909_v32 = vpop.f32.mrf.mxu0 }
 0x1bb   : > { %v1166_v33 = vpop.f32.mrf.mxu1 }
 0x1bc   : > { %1445 = vst [vmem:[%s2198_s28 + $0x198] sm:$0xff] %v1250_v30  ;;  %v1251_v34 = vadd.f32 %v1165_v31, %v2193_v5  ;;  %v1167_v35 = vadd.f32 %v1166_v33, %v909_v32  ;;  %v913_v36 = vpop.f32.mrf.mxu0 }
 0x1bd   : > { %v1170_v37 = vpop.f32.mrf.mxu1 }
 0x1be   : > { %1446 = vst [vmem:[%s2198_s28 + $0x1a0] sm:$0xff] %v1251_v34  ;;  %v1252_v38 = vadd.f32 %v1167_v35, %v2195_v9  ;;  %v1171_v39 = vadd.f32 %v1170_v37, %v913_v36  ;;  %v915_v40 = vpop.f32.mrf.mxu0 }
 0x1bf   : > { %v1172_v41 = vpop.f32.mrf.mxu1 }
 0x1c0   : > { %1447 = vst [vmem:[%s2198_s28 + $0x1a8] sm:$0xff] %v1252_v38  ;;  %v1253_v42 = vadd.f32 %v1171_v39, %v2193_v5  ;;  %v1173_v43 = vadd.f32 %v1172_v41, %v915_v40  ;;  %v919_v44 = vpop.f32.mrf.mxu0 }
 0x1c1   : > { %v1176_v45 = vpop.f32.mrf.mxu1 }
 0x1c2   : > { %1448 = vst [vmem:[%s2198_s28 + $0x1b0] sm:$0xff] %v1253_v42  ;;  %v1254_v46 = vadd.f32 %v1173_v43, %v2195_v9  ;;  %v1177_v47 = vadd.f32 %v1176_v45, %v919_v44  ;;  %v921_v48 = vpop.f32.mrf.mxu0 }
 0x1c3   : > { %v1178_v49 = vpop.f32.mrf.mxu1 }
 0x1c4   : > { %1449 = vst [vmem:[%s2198_s28 + $0x1b8] sm:$0xff] %v1254_v46  ;;  %v1255_v50 = vadd.f32 %v1177_v47, %v2193_v5  ;;  %v1179_v51 = vadd.f32 %v1178_v49, %v921_v48  ;;  %v925_v52 = vpop.f32.mrf.mxu0 }
 0x1c5   : > { %v1182_v53 = vpop.f32.mrf.mxu1 }
 0x1c6   : > { %1450 = vst [vmem:[%s2198_s28 + $0x1c0] sm:$0xff] %v1255_v50  ;;  %v1256_v54 = vadd.f32 %v1179_v51, %v2195_v9  ;;  %v1183_v55 = vadd.f32 %v1182_v53, %v925_v52  ;;  %v927_v56 = vpop.f32.mrf.mxu0 }
 0x1c7   : > { %v1184_v57 = vpop.f32.mrf.mxu1 }
 0x1c8   : > { %1451 = vst [vmem:[%s2198_s28 + $0x1c8] sm:$0xff] %v1256_v54  ;;  %v1257_v58 = vadd.f32 %v1183_v55, %v2193_v5  ;;  %v1185_v59 = vadd.f32 %v1184_v57, %v927_v56  ;;  %v931_v60 = vpop.f32.mrf.mxu0 }
 0x1c9   : > { %v1188_v61 = vpop.f32.mrf.mxu1 }
 0x1ca   : > { %1452 = vst [vmem:[%s2198_s28 + $0x1d0] sm:$0xff] %v1257_v58  ;;  %v1258_v62 = vadd.f32 %v1185_v59, %v2195_v9  ;;  %v1189_v63 = vadd.f32 %v1188_v61, %v931_v60  ;;  %v933_v0 = vpop.f32.mrf.mxu0 }
 0x1cb   : > { %v1190_v1 = vpop.f32.mrf.mxu1 }
 0x1cc   : > { %1453 = vst [vmem:[%s2198_s28 + $0x1d8] sm:$0xff] %v1258_v62  ;;  %v1259_v2 = vadd.f32 %v1189_v63, %v2193_v5  ;;  %v1191_v3 = vadd.f32 %v1190_v1, %v933_v0  ;;  %v937_v4 = vpop.f32.mrf.mxu0 }
 0x1cd   : > { %v1194_v6 = vpop.f32.mrf.mxu1 }
 0x1ce   : > { %1454 = vst [vmem:[%s2198_s28 + $0x1e0] sm:$0xff] %v1259_v2  ;;  %v1260_v7 = vadd.f32 %v1191_v3, %v2195_v9  ;;  %v1195_v8 = vadd.f32 %v1194_v6, %v937_v4  ;;  %v939_v10 = vpop.f32.mrf.mxu0 }
 0x1cf   : > { %v1196_v11 = vpop.f32.mrf.mxu1 }
 0x1d0   : > { %1455 = vst [vmem:[%s2198_s28 + $0x1e8] sm:$0xff] %v1260_v7  ;;  %v1261_v12 = vadd.f32 %v1195_v8, %v2193_v5  ;;  %v1197_v13 = vadd.f32 %v1196_v11, %v939_v10 }
 0x1d2   : > { %1456 = vst [vmem:[%s2198_s28 + $0x1f0] sm:$0xff] %v1261_v12  ;;  %v1262_v14 = vadd.f32 %v1197_v13, %v2195_v9 }
 0x1d4   : > { %1457 = vst [vmem:[%s2198_s28 + $0x1f8] sm:$0xff] %v1262_v14 }
 0x1d5   : > { %1806 = shalt.err (!%p1803_p3)
}
 0x1d6   : > { %s1807_s10 = scalar_lea.hbm %s2329_s7, 8192  ;;  %s1811_s6 = scalar_lea.hbm %s2385_s3, 16384 }
 0x1d7   : > { %p1808_p6 = scmp.ne.s32.totalorder %s2329_s7, %s1807_s10  ;;  %p1812_p12 = scmp.lt.s32.totalorder %s2329_s7, %s2385_s3 }
 0x1d8   : > { %p1813_p13 = scmp.lt.s32.totalorder %s1811_s6, %s1807_s10 }
 0x1d9   : > { %p1809_p9 = pnand %p1808_p6, %p2396_p5 }
 0x1da   : > { %p1814_p11 = por %p1813_p13, %p1812_p12 }
 0x1db   : > { %p1810_p8 = pneg %p1809_p9 }
 0x1dd   : > { %p1815_p7 = pnand %p1814_p11, %p1810_p8 }
 0x1df   : > { %1818 = shalt.err (!%p1815_p7)
}
 0x1e0   : > { %s1887_s28 = smov 256   ;;  %s1888_s9 = smov 512  }
 0x1e1   : > { %s1889_s4 = smov 16  }
 0x1e2   : > { %1634 = dma.vmem_to_hbm [thread:$0]  (%p2396_p5), %s2331_s22, 8192, %s2329_s7, %s1459_s15, %s1887_s28, %s1888_s9, %s1889_s4  }
 0x1e3 PF: > { %s1490_s8 = sand.u32 1, %s1857_s12   ;;  %p2397_p10 = scmp.ne.s32.totalorder %s2392_s27, 0 }
 0x1e4   : > { %p2398_p2 = scmp.ge.s32.totalorder %s1877_s17, 2  ;;  %s1491_s19 = scalar_lea.sflag [#allocation5], %s1490_s8 }
 0x1e6   : > { %p1648_p1 = pnand %p2398_p2, %p2397_p10 }
 0x1e8   : > { %p1649_p0 = pneg %p1648_p1 }
 0x1ea   : > { %1852 = dma.done.wait (%p1649_p0), %s1491_s19, 8192  }
 0x1eb   : > { %1854 = vsyncadd (%p1649_p0), %s1491_s19, 4294959104  ;;  %s20_s17 = sadd.s32 1, %s1877_s17   ;;  %s2399_s12 = smov %s1861_s13 }
 0x1ec   : > { %p17_p4 = scmp.ge.s32.totalorder %s20_s17, 4   ;;  %s2400_s13 = smov %s1865_s14 }
 0x1ed   : > { %s2401_s14 = smov %s1961_s24  ;;  %s2402_s15 = smov %s1873_s16 }
 0x1ee   : > { %s2403_s16 = smov %s2405_s18  ;;  %19 = sbr.rel (!%p17_p4) target bundleno = 7 (0x7), region = 102 }
 0x1f3   :  { %1496 = vsyncpa [#allocation4], 1 }
 0x1f4   :  { %1498 = vsyncpa [#allocation4 + $0x1], 1 }
 0x1f5   :  { %1499 = vsyncpa [#allocation7], 1 }
 0x1f6   :  { %1501 = vsyncpa [#allocation7 + $0x1], 1 }
 0x1f7   :  { %1502 = vsyncpa [#allocation5], 1 }
 0x1f8   :  { %1504 = vsyncpa [#allocation5 + $0x1], 1 }

</bundles_post_ra>
